<compile_context>
chip_gen: v5e
topology: v5e:2x2
jax: 0.10.0
libtpu: 0.0.40
codegen_flags: <defaults>
</compile_context>

<pallas_src>
import functools

import jax
import jax.numpy as jnp
from jax.experimental import pallas as pl
from jax.experimental.pallas import tpu as pltpu


def _round_up(a, b):
    return -(-a // b) * b


def _full_spec(shape):
    # Whole-array block; grid=(1,) so the index map always returns block 0.
    return pl.BlockSpec(shape, lambda i: (0,) * len(shape))


# ---------------------------------------------------------------------------
# Fused NNConv kernel:
#   per edge tile: edge-MLP -> per-edge weights (in VMEM only) -> gather src rows via
#   one-hot matmul -> message FMA loop -> scatter-add into the resident [n_tile, C_out]
#   accumulator via one-hot matmul; finalize with root transform + bias (+ relu).
# ---------------------------------------------------------------------------
def fused_nnconv_kernel(xfull_ref, xblk_ref, src_ref, tgt_ref, ea_ref,
                        w1_ref, b1_ref, w2_ref, b2_ref, root_ref, bias_ref,
                        out_ref, acc_ref, *, c_in, c_out, n_tile, apply_relu):
    e_idx = pl.program_id(1)

    @pl.when(e_idx == 0)
    def _init():
        acc_ref[...] = jnp.zeros_like(acc_ref)

    e_t = ea_ref.shape[0]
    n_full = xfull_ref.shape[0]

    # --- fused per-edge MLP (Linear -> ReLU -> Linear), never leaves VMEM -------------
    h = jnp.dot(ea_ref[...], w1_ref[...], preferred_element_type=jnp.float32) + b1_ref[...]
    h = jnp.maximum(h, 0.0)
    w_flat = jnp.dot(h, w2_ref[...], preferred_element_type=jnp.float32) + b2_ref[...]
    # w_flat: [e_t, c_in*c_out], row-major [c_in, c_out] per edge (matches torch .view)

    # --- gather x[src(e)] via one-hot matmul on the MXU --------------------------------
    node_ids = jax.lax.broadcasted_iota(jnp.int32, (e_t, n_full), 1)
    gather = jnp.where(node_ids == src_ref[...], 1.0, 0.0)            # [e_t, n_full]
    x_src = jnp.dot(gather, xfull_ref[...],
                    preferred_element_type=jnp.float32)               # [e_t, c_in]

    # --- message: msg[e, :] = x_src[e, :] @ W_e  (unrolled 2-D FMAs, no 3-D temp) ------
    msg = jnp.zeros((e_t, c_out), jnp.float32)
    for c in range(c_in):
        msg = msg + x_src[:, c:c + 1] * w_flat[:, c * c_out:(c + 1) * c_out]

    # --- scatter-add into this kernel's node-row tile (one-hot matmul on the MXU) ------
    n_off = pl.program_id(0) * n_tile
    row_ids = jax.lax.broadcasted_iota(jnp.int32, (n_tile, e_t), 0) + n_off
    scatter = jnp.where(row_ids == tgt_ref[...], 1.0, 0.0)            # [n_tile, e_t]
    acc_ref[...] += jnp.dot(scatter, msg, preferred_element_type=jnp.float32)

    # --- finalize on the last edge tile: root transform + bias (+ fused relu) ----------
    @pl.when(e_idx == pl.num_programs(1) - 1)
    def _finalize():
        root = jnp.dot(xblk_ref[...], root_ref[...], preferred_element_type=jnp.float32)
        out = acc_ref[...] + root + bias_ref[...]
        if apply_relu:
            out = jnp.maximum(out, 0.0)
        out_ref[...] = out


def fused_nnconv(x_full, src_col, tgt_row, ea, w1, b1, w2, b2, root, bias, *,
                 c_in, c_out, apply_relu, e_tile, n_tile):
    n_pad = x_full.shape[0]
    e_pad, f_e = ea.shape
    h_mlp = w1.shape[1]
    assert n_pad % n_tile == 0 and e_pad % e_tile == 0

    kernel = functools.partial(fused_nnconv_kernel, c_in=c_in, c_out=c_out,
                               n_tile=n_tile, apply_relu=apply_relu)
    grid = (n_pad // n_tile, e_pad // e_tile)

    return pl.pallas_call(
        kernel,
        out_shape=jax.ShapeDtypeStruct((n_pad, c_out), jnp.float32),
        grid_spec=pltpu.PrefetchScalarGridSpec(
            num_scalar_prefetch=0,
            grid=grid,
            in_specs=[
                pl.BlockSpec((n_pad, c_in), lambda n, e: (0, 0)),          # x (gather source)
                pl.BlockSpec((n_tile, c_in), lambda n, e: (n, 0)),         # x tile (root path)
                pl.BlockSpec((e_tile, 1), lambda n, e: (e, 0)),            # src indices (col)
                pl.BlockSpec((1, e_tile), lambda n, e: (0, e)),            # tgt indices (row)
                pl.BlockSpec((e_tile, f_e), lambda n, e: (e, 0)),          # edge_attr tile
                pl.BlockSpec((f_e, h_mlp), lambda n, e: (0, 0)),           # edge-MLP w1 (padded)
                pl.BlockSpec((1, h_mlp), lambda n, e: (0, 0)),             # edge-MLP b1 (padded)
                pl.BlockSpec((h_mlp, c_in * c_out), lambda n, e: (0, 0)),  # edge-MLP w2 (padded)
                pl.BlockSpec((1, c_in * c_out), lambda n, e: (0, 0)),      # edge-MLP b2
                pl.BlockSpec((c_in, c_out), lambda n, e: (0, 0)),          # root weight
                pl.BlockSpec((1, c_out), lambda n, e: (0, 0)),             # bias
            ],
            out_specs=pl.BlockSpec((n_tile, c_out), lambda n, e: (n, 0)),
            scratch_shapes=[pltpu.VMEM((n_tile, c_out), jnp.float32)],
        ),
        compiler_params=pltpu.CompilerParams(
            dimension_semantics=("parallel", "arbitrary"),
            vmem_limit_bytes=32 * 1024 * 1024,
        ),
    )(x_full, x_full, src_col, tgt_row, ea, w1, b1, w2, b2, root, bias)


# ---------------------------------------------------------------------------
# Fused head kernel: target-pair gather (one-hot matmul) + BatchNorm1d (training-mode
# batch stats) + Linear + sigmoid.  The concat is expressed as a feature-split (exactly
# equivalent: BN is per-feature, and the linear weight is split by row blocks).
# ---------------------------------------------------------------------------
def fused_head_kernel(h_ref, t1_ref, t2_ref, gamma_ref, beta_ref, w_ref, b_ref,
                      out_ref, *, hidden):
    n_full = h_ref.shape[0]
    t = t1_ref.shape[0]

    node_ids = jax.lax.broadcasted_iota(jnp.int32, (t, n_full), 1)
    g1 = jnp.where(node_ids == t1_ref[...], 1.0, 0.0)
    g2 = jnp.where(node_ids == t2_ref[...], 1.0, 0.0)
    hmat = h_ref[...]
    x1 = jnp.dot(g1, hmat, preferred_element_type=jnp.float32)   # [T, hidden]
    x2 = jnp.dot(g2, hmat, preferred_element_type=jnp.float32)   # [T, hidden]

    gamma = gamma_ref[...]
    beta = beta_ref[...]
    w = w_ref[...]

    def bn(xp, g, b):
        mean = jnp.mean(xp, axis=0, keepdims=True)
        var = jnp.mean(jnp.square(xp - mean), axis=0, keepdims=True)  # biased (training BN)
        return (xp - mean) * jax.lax.rsqrt(var + 1e-5) * g + b

    xbn1 = bn(x1, gamma[:, :hidden], beta[:, :hidden])
    xbn2 = bn(x2, gamma[:, hidden:], beta[:, hidden:])
    logits = (jnp.dot(xbn1, w[:hidden, :], preferred_element_type=jnp.float32)
              + jnp.dot(xbn2, w[hidden:, :], preferred_element_type=jnp.float32)
              + b_ref[...])
    out_ref[...] = jax.nn.sigmoid(logits)


def fused_head(h, t1_col, t2_col, gamma, beta, lin_w, lin_b):
    n_pad, hidden = h.shape
    t = t1_col.shape[0]
    two_h, out_dim = lin_w.shape
    assert two_h == 2 * hidden

    kernel = functools.partial(fused_head_kernel, hidden=hidden)
    return pl.pallas_call(
        kernel,
        out_shape=jax.ShapeDtypeStruct((t, out_dim), jnp.float32),
        grid=(1,),
        in_specs=[
            _full_spec((n_pad, hidden)),
            _full_spec((t, 1)),
            _full_spec((t, 1)),
            _full_spec((1, two_h)),
            _full_spec((1, two_h)),
            _full_spec((two_h, out_dim)),
            _full_spec((1, out_dim)),
        ],
        out_specs=_full_spec((t, out_dim)),
        compiler_params=pltpu.CompilerParams(vmem_limit_bytes=32 * 1024 * 1024),
    )(h, t1_col, t2_col, gamma.reshape(1, two_h), beta.reshape(1, two_h),
      lin_w, lin_b.reshape(1, out_dim))


# ---------------------------------------------------------------------------
# Host-side glue: padding (exact), index layout, parameter padding for lane-dense MXU tiles.
# ---------------------------------------------------------------------------
def _pad_edge_mlp(w1, b1, w2, b2):
    # Pad the edge-MLP hidden dim (100 -> 128) with zeros: mathematically exact because
    # ReLU(0 + 0) = 0 and the matching rows of w2 are zero.
    hm = w1.shape[1]
    hm_pad = _round_up(hm, 128)
    w1p = jnp.pad(w1, ((0, 0), (0, hm_pad - hm)))
    b1p = jnp.pad(b1.reshape(1, hm), ((0, 0), (0, hm_pad - hm)))
    w2p = jnp.pad(w2, ((0, hm_pad - hm), (0, 0)))
    return w1p, b1p, w2p, b2.reshape(1, -1)


def ddi_nnconv_forward(params, x, edge_index, edge_attr, target_edge_index,
                       *, e_tile=None, n_tile=None):
    n, in_dim = x.shape
    e = edge_index.shape[1]
    hidden = params["root1"].shape[1]
    t = target_edge_index.shape[1]

    if e_tile is None:
        e_tile = min(512, _round_up(e, 128))   # lane-dense edge tiles; bigger at real sizes
    e_pad = _round_up(e, e_tile)
    n_pad = _round_up(n, 8)
    if n_tile is None:
        # two node tiles when possible -> exercises the 'parallel' axis (megacore on v7x)
        n_tile = n_pad // 2 if (n_pad % 16 == 0) else n_pad

    x_p = jnp.pad(x.astype(jnp.float32), ((0, n_pad - n), (0, 0)))
    # padded edges: src -> 0 (harmless gather), tgt -> -1 (matches no node => zero scatter)
    src_col = jnp.pad(edge_index[0].astype(jnp.int32), (0, e_pad - e)).reshape(e_pad, 1)
    tgt_row = jnp.pad(edge_index[1].astype(jnp.int32), (0, e_pad - e),
                      constant_values=-1).reshape(1, e_pad)
    ea_p = jnp.pad(edge_attr.astype(jnp.float32), ((0, e_pad - e), (0, 0)))

    nn1 = _pad_edge_mlp(params["nn1_w1"], params["nn1_b1"], params["nn1_w2"], params["nn1_b2"])
    nn2 = _pad_edge_mlp(params["nn2_w1"], params["nn2_b1"], params["nn2_w2"], params["nn2_b2"])

    # conv1 + fused ReLU
    h = fused_nnconv(x_p, src_col, tgt_row, ea_p, *nn1,
                     params["root1"], params["bias1"].reshape(1, hidden),
                     c_in=in_dim, c_out=hidden, apply_relu=True,
                     e_tile=e_tile, n_tile=n_tile)
    # conv2
    h = fused_nnconv(h, src_col, tgt_row, ea_p, *nn2,
                     params["root2"], params["bias2"].reshape(1, hidden),
                     c_in=hidden, c_out=hidden, apply_relu=False,
                     e_tile=e_tile, n_tile=n_tile)

    # fused head: gather target pairs + concat + BN + Linear + sigmoid
    t1 = target_edge_index[0].astype(jnp.int32).reshape(t, 1)
    t2 = target_edge_index[1].astype(jnp.int32).reshape(t, 1)
    return fused_head(h, t1, t2, params["bn_gamma"], params["bn_beta"],
                      params["lin_w"], params["lin_b"])


# ---------------------------------------------------------------------------
# Pure-JAX reference (for a correctness sanity check).
# ---------------------------------------------------------------------------
def ddi_nnconv_reference(params, x, edge_index, edge_attr, target_edge_index):
    src, tgt = edge_index[0], edge_index[1]
    n, in_dim = x.shape
    hidden = params["root1"].shape[1]

    def edge_mlp(ea, w1, b1, w2, b2):
        return jnp.maximum(ea @ w1 + b1, 0.0) @ w2 + b2

    def nnconv(xx, ew_flat, root, bias, c_in, c_out):
        w3 = ew_flat.reshape(-1, c_in, c_out)
        msg = jnp.einsum("ec,eco->eo", xx[src], w3)
        agg = jnp.zeros((n, c_out), jnp.float32).at[tgt].add(msg)
        return agg + xx @ root + bias.reshape(1, c_out)

    h = jnp.maximum(
        nnconv(x, edge_mlp(edge_attr, params["nn1_w1"], params["nn1_b1"],
                           params["nn1_w2"], params["nn1_b2"]),
               params["root1"], params["bias1"], in_dim, hidden), 0.0)
    h = nnconv(h, edge_mlp(edge_attr, params["nn2_w1"], params["nn2_b1"],
                           params["nn2_w2"], params["nn2_b2"]),
               params["root2"], params["bias2"], hidden, hidden)
    x1 = h[target_edge_index[0]]
    x2 = h[target_edge_index[1]]
    xc = jnp.concatenate([x1, x2], axis=-1)
    mean = jnp.mean(xc, axis=0, keepdims=True)
    var = jnp.mean(jnp.square(xc - mean), axis=0, keepdims=True)
    xb = (xc - mean) * jax.lax.rsqrt(var + 1e-5) * params["bn_gamma"] + params["bn_beta"]
    return jax.nn.sigmoid(xb @ params["lin_w"] + params["lin_b"])


def init_params(key, in_dim, hidden_dim, out_dim):
    ks = jax.random.split(key, 12)
    s = 0.1

    def nrm(k, shape):
        return (s * jax.random.normal(k, shape)).astype(jnp.float32)

    return {
        # edge-NN 1: out_dim -> 100 -> in_dim*hidden
        "nn1_w1": nrm(ks[0], (out_dim, 100)),
        "nn1_b1": nrm(ks[1], (1, 100)),
        "nn1_w2": nrm(ks[2], (100, in_dim * hidden_dim)),
        "nn1_b2": nrm(ks[3], (1, in_dim * hidden_dim)),
        "root1": nrm(ks[4], (in_dim, hidden_dim)),
        "bias1": nrm(ks[5], (hidden_dim,)),
        # edge-NN 2: out_dim -> 100 -> hidden*hidden
        "nn2_w1": nrm(ks[6], (out_dim, 100)),
        "nn2_b1": nrm(ks[7], (1, 100)),
        "nn2_w2": nrm(ks[8], (100, hidden_dim * hidden_dim)),
        "nn2_b2": nrm(ks[9], (1, hidden_dim * hidden_dim)),
        "root2": nrm(ks[10], (hidden_dim, hidden_dim)),
        "bias2": nrm(ks[11], (hidden_dim,)),
        # BatchNorm1d(2*hidden) default init  (training-mode batch stats, matching .train())
        "bn_gamma": jnp.ones((2 * hidden_dim,), jnp.float32),
        "bn_beta": jnp.zeros((2 * hidden_dim,), jnp.float32),
        # final Linear(2*hidden -> out_dim)
        "lin_w": nrm(jax.random.fold_in(key, 100), (2 * hidden_dim, out_dim)),
        "lin_b": nrm(jax.random.fold_in(key, 101), (out_dim,)),
    }


if __name__ == "__main__":
    in_dim, hidden_dim, out_dim = 4, 32, 8
    N, E, T = 16, 32, 8  # nodes, message-passing edges, target (query) edges

    key = jax.random.PRNGKey(0)
    k_param, k_x, k_ei, k_ea, k_te = jax.random.split(key, 5)

    params = init_params(k_param, in_dim, hidden_dim, out_dim)

    x = jax.random.normal(k_x, (N, in_dim), dtype=jnp.float32)
    edge_index = jax.random.randint(k_ei, (2, E), 0, N, dtype=jnp.int32)
    edge_attr = jax.random.normal(k_ea, (E, out_dim), dtype=jnp.float32)
    target_edge_index = jax.random.randint(k_te, (2, T), 0, N, dtype=jnp.int32)

    out = ddi_nnconv_forward(params, x, edge_index, edge_attr, target_edge_index)
    out = jax.block_until_ready(out)

    assert out.shape == (T, out_dim)
    assert bool(jnp.all(jnp.isfinite(out)))

    # Sanity check against the pure-JAX reference (loose tolerance: MXU default precision
    # uses bf16 passes for f32 matmuls).
    ref = ddi_nnconv_reference(params, x, edge_index, edge_attr, target_edge_index)
    assert float(jnp.max(jnp.abs(out - ref))) < 5e-2

    print("KERNEL_OK")
</pallas_src>

<mosaic_0001>
module attributes {stable_mosaic.version = 11 : i64} {
  func.func @fused_nnconv_kernel(%arg0: i32, %arg1: i32, %arg2: memref<16x4xf32, #tpu.memory_space<vmem>>, %arg3: memref<8x4xf32, #tpu.memory_space<vmem>>, %arg4: memref<128x1xi32, #tpu.memory_space<vmem>>, %arg5: memref<1x128xi32, #tpu.memory_space<vmem>>, %arg6: memref<128x8xf32, #tpu.memory_space<vmem>>, %arg7: memref<8x128xf32, #tpu.memory_space<vmem>>, %arg8: memref<1x128xf32, #tpu.memory_space<vmem>>, %arg9: memref<128x128xf32, #tpu.memory_space<vmem>>, %arg10: memref<1x128xf32, #tpu.memory_space<vmem>>, %arg11: memref<4x32xf32, #tpu.memory_space<vmem>>, %arg12: memref<1x32xf32, #tpu.memory_space<vmem>>, %arg13: memref<8x32xf32, #tpu.memory_space<vmem>>, %arg14: memref<8x32xf32, #tpu.memory_space<vmem>>) attributes {dimension_semantics = [#tpu.dimension_semantics<parallel>, #tpu.dimension_semantics<arbitrary>], iteration_bounds = array<i64: 2, 1>, scalar_prefetch = 0 : i64, scratch_operands = 1 : i64, tpu.core_type = #tpu.core_type<tc>, window_params = [{pipeline_mode = #tpu.pipeline_mode<synchronous>, transform_indices = @transform_0, window_bounds = array<i64: 16, 4>}, {transform_indices = @transform_1, window_bounds = array<i64: 8, 4>}, {transform_indices = @transform_2, window_bounds = array<i64: 128, 1>}, {transform_indices = @transform_3, window_bounds = array<i64: 1, 128>}, {transform_indices = @transform_4, window_bounds = array<i64: 128, 8>}, {pipeline_mode = #tpu.pipeline_mode<synchronous>, transform_indices = @transform_5, window_bounds = array<i64: 8, 128>}, {pipeline_mode = #tpu.pipeline_mode<synchronous>, transform_indices = @transform_6, window_bounds = array<i64: 1, 128>}, {pipeline_mode = #tpu.pipeline_mode<synchronous>, transform_indices = @transform_7, window_bounds = array<i64: 128, 128>}, {pipeline_mode = #tpu.pipeline_mode<synchronous>, transform_indices = @transform_8, window_bounds = array<i64: 1, 128>}, {pipeline_mode = #tpu.pipeline_mode<synchronous>, transform_indices = @transform_9, window_bounds = array<i64: 4, 32>}, {pipeline_mode = #tpu.pipeline_mode<synchronous>, transform_indices = @transform_10, window_bounds = array<i64: 1, 32>}, {transform_indices = @transform_11, window_bounds = array<i64: 8, 32>}]} {
    %c0_i32 = arith.constant 0 : i32
    %0 = arith.cmpi eq, %arg1, %c0_i32 : i32
    %1 = arith.extui %0 : i1 to i32
    %c0_i32_0 = arith.constant 0 : i32
    %2 = arith.cmpi ne, %1, %c0_i32_0 : i32
    scf.if %2 {
      %cst_31 = arith.constant 0.000000e+00 : f32
      %63 = vector.broadcast %cst_31 : f32 to vector<8x32xf32>
      %c0_32 = arith.constant 0 : index
      %c0_33 = arith.constant 0 : index
      %64 = vector.load %arg14[%c0_32, %c0_33] : memref<8x32xf32, #tpu.memory_space<vmem>>, vector<8x32xf32>
      tpu.vector_store %arg14[%c0_32, %c0_33], %63 {strides = array<i32>} : memref<8x32xf32, #tpu.memory_space<vmem>>, vector<8x32xf32>,
    } else {
    }
    %c0 = arith.constant 0 : index
    %c0_1 = arith.constant 0 : index
    %3 = vector.load %arg6[%c0, %c0_1] : memref<128x8xf32, #tpu.memory_space<vmem>>, vector<128x8xf32>
    %c0_2 = arith.constant 0 : index
    %c0_3 = arith.constant 0 : index
    %4 = vector.load %arg7[%c0_2, %c0_3] : memref<8x128xf32, #tpu.memory_space<vmem>>, vector<8x128xf32>
    %cst = arith.constant dense<0.000000e+00> : vector<128x128xf32>
    %5 = tpu.matmul %3, %4, %cst {dimension_numbers = #tpu.dot_dimension_numbers<[1], [0], [0], [1], [0, 0, 1, 1], [], []>} : vector<128x8xf32>, vector<8x128xf32>, vector<128x128xf32> -> vector<128x128xf32>
    %c0_4 = arith.constant 0 : index
    %c0_5 = arith.constant 0 : index
    %6 = vector.load %arg8[%c0_4, %c0_5] : memref<1x128xf32, #tpu.memory_space<vmem>>, vector<1x128xf32>
    %7 = vector.broadcast %6 : vector<1x128xf32> to vector<128x128xf32>
    %8 = arith.addf %5, %7 : vector<128x128xf32>
    %cst_6 = arith.constant 0.000000e+00 : f32
    %9 = vector.broadcast %cst_6 : f32 to vector<128x128xf32>
    %10 = arith.maximumf %8, %9 : vector<128x128xf32>
    %c0_7 = arith.constant 0 : index
    %c0_8 = arith.constant 0 : index
    %11 = vector.load %arg9[%c0_7, %c0_8] : memref<128x128xf32, #tpu.memory_space<vmem>>, vector<128x128xf32>
    %cst_9 = arith.constant dense<0.000000e+00> : vector<128x128xf32>
    %12 = tpu.matmul %10, %11, %cst_9 {dimension_numbers = #tpu.dot_dimension_numbers<[1], [0], [0], [1], [0, 0, 1, 1], [], []>} : vector<128x128xf32>, vector<128x128xf32>, vector<128x128xf32> -> vector<128x128xf32>
    %c0_10 = arith.constant 0 : index
    %c0_11 = arith.constant 0 : index
    %13 = vector.load %arg10[%c0_10, %c0_11] : memref<1x128xf32, #tpu.memory_space<vmem>>, vector<1x128xf32>
    %14 = vector.broadcast %13 : vector<1x128xf32> to vector<128x128xf32>
    %15 = arith.addf %12, %14 : vector<128x128xf32>
    %16 = tpu.iota {dimensions = array<i32: 1>} : vector<128x16xi32>
    %c0_12 = arith.constant 0 : index
    %c0_13 = arith.constant 0 : index
    %17 = vector.load %arg4[%c0_12, %c0_13] : memref<128x1xi32, #tpu.memory_space<vmem>>, vector<128x1xi32>
    %18 = vector.broadcast %17 : vector<128x1xi32> to vector<128x16xi32>
    %19 = arith.cmpi eq, %16, %18 : vector<128x16xi32>
    %cst_14 = arith.constant 1.000000e+00 : f32
    %cst_15 = arith.constant 0.000000e+00 : f32
    %20 = vector.broadcast %cst_14 : f32 to vector<128x16xf32>
    %21 = vector.broadcast %cst_15 : f32 to vector<128x16xf32>
    %22 = arith.select %19, %20, %21 : vector<128x16xi1>, vector<128x16xf32>
    %c0_16 = arith.constant 0 : index
    %c0_17 = arith.constant 0 : index
    %23 = vector.load %arg2[%c0_16, %c0_17] : memref<16x4xf32, #tpu.memory_space<vmem>>, vector<16x4xf32>
    %cst_18 = arith.constant dense<0.000000e+00> : vector<128x4xf32>
    %24 = tpu.matmul %22, %23, %cst_18 {dimension_numbers = #tpu.dot_dimension_numbers<[1], [0], [0], [1], [0, 0, 1, 1], [], []>} : vector<128x16xf32>, vector<16x4xf32>, vector<128x4xf32> -> vector<128x4xf32>
    %cst_19 = arith.constant 0.000000e+00 : f32
    %25 = vector.broadcast %cst_19 : f32 to vector<128x32xf32>
    %26 = vector.extract_strided_slice %24 {offsets = [0, 0], sizes = [128, 1], strides = [1, 1]} : vector<128x4xf32> to vector<128x1xf32>
    %27 = vector.extract_strided_slice %15 {offsets = [0, 0], sizes = [128, 32], strides = [1, 1]} : vector<128x128xf32> to vector<128x32xf32>
    %28 = vector.broadcast %26 : vector<128x1xf32> to vector<128x32xf32>
    %29 = arith.mulf %28, %27 : vector<128x32xf32>
    %30 = arith.addf %25, %29 : vector<128x32xf32>
    %31 = vector.extract_strided_slice %24 {offsets = [0, 1], sizes = [128, 1], strides = [1, 1]} : vector<128x4xf32> to vector<128x1xf32>
    %32 = vector.extract_strided_slice %15 {offsets = [0, 32], sizes = [128, 32], strides = [1, 1]} : vector<128x128xf32> to vector<128x32xf32>
    %33 = vector.broadcast %31 : vector<128x1xf32> to vector<128x32xf32>
    %34 = arith.mulf %33, %32 : vector<128x32xf32>
    %35 = arith.addf %30, %34 : vector<128x32xf32>
    %36 = vector.extract_strided_slice %24 {offsets = [0, 2], sizes = [128, 1], strides = [1, 1]} : vector<128x4xf32> to vector<128x1xf32>
    %37 = vector.extract_strided_slice %15 {offsets = [0, 64], sizes = [128, 32], strides = [1, 1]} : vector<128x128xf32> to vector<128x32xf32>
    %38 = vector.broadcast %36 : vector<128x1xf32> to vector<128x32xf32>
    %39 = arith.mulf %38, %37 : vector<128x32xf32>
    %40 = arith.addf %35, %39 : vector<128x32xf32>
    %41 = vector.extract_strided_slice %24 {offsets = [0, 3], sizes = [128, 1], strides = [1, 1]} : vector<128x4xf32> to vector<128x1xf32>
    %42 = vector.extract_strided_slice %15 {offsets = [0, 96], sizes = [128, 32], strides = [1, 1]} : vector<128x128xf32> to vector<128x32xf32>
    %43 = vector.broadcast %41 : vector<128x1xf32> to vector<128x32xf32>
    %44 = arith.mulf %43, %42 : vector<128x32xf32>
    %45 = arith.addf %40, %44 : vector<128x32xf32>
    %c8_i32 = arith.constant 8 : i32
    %46 = arith.muli %arg0, %c8_i32 : i32
    %47 = tpu.iota {dimensions = array<i32: 0>} : vector<8x128xi32>
    %48 = vector.broadcast %46 : i32 to vector<8x128xi32>
    %49 = arith.addi %47, %48 : vector<8x128xi32>
    %c0_20 = arith.constant 0 : index
    %c0_21 = arith.constant 0 : index
    %50 = vector.load %arg5[%c0_20, %c0_21] : memref<1x128xi32, #tpu.memory_space<vmem>>, vector<1x128xi32>
    %51 = vector.broadcast %50 : vector<1x128xi32> to vector<8x128xi32>
    %52 = arith.cmpi eq, %49, %51 : vector<8x128xi32>
    %cst_22 = arith.constant 1.000000e+00 : f32
    %cst_23 = arith.constant 0.000000e+00 : f32
    %53 = vector.broadcast %cst_22 : f32 to vector<8x128xf32>
    %54 = vector.broadcast %cst_23 : f32 to vector<8x128xf32>
    %55 = arith.select %52, %53, %54 : vector<8x128xi1>, vector<8x128xf32>
    %c0_24 = arith.constant 0 : index
    %c0_25 = arith.constant 0 : index
    %56 = vector.load %arg14[%c0_24, %c0_25] : memref<8x32xf32, #tpu.memory_space<vmem>>, vector<8x32xf32>
    %cst_26 = arith.constant dense<0.000000e+00> : vector<8x32xf32>
    %57 = tpu.matmul %55, %45, %cst_26 {dimension_numbers = #tpu.dot_dimension_numbers<[1], [0], [0], [1], [0, 0, 1, 1], [], []>} : vector<8x128xf32>, vector<128x32xf32>, vector<8x32xf32> -> vector<8x32xf32>
    %58 = arith.addf %56, %57 : vector<8x32xf32>
    %c0_27 = arith.constant 0 : index
    %c0_28 = arith.constant 0 : index
    %59 = vector.load %arg14[%c0_27, %c0_28] : memref<8x32xf32, #tpu.memory_space<vmem>>, vector<8x32xf32>
    tpu.vector_store %arg14[%c0_27, %c0_28], %58 {strides = array<i32>} : memref<8x32xf32, #tpu.memory_space<vmem>>, vector<8x32xf32>,
    %c0_i32_29 = arith.constant 0 : i32
    %60 = arith.cmpi eq, %arg1, %c0_i32_29 : i32
    %61 = arith.extui %60 : i1 to i32
    %c0_i32_30 = arith.constant 0 : i32
    %62 = arith.cmpi ne, %61, %c0_i32_30 : i32
    scf.if %62 {
      %c0_31 = arith.constant 0 : index
      %c0_32 = arith.constant 0 : index
      %63 = vector.load %arg3[%c0_31, %c0_32] : memref<8x4xf32, #tpu.memory_space<vmem>>, vector<8x4xf32>
      %c0_33 = arith.constant 0 : index
      %c0_34 = arith.constant 0 : index
      %64 = vector.load %arg11[%c0_33, %c0_34] : memref<4x32xf32, #tpu.memory_space<vmem>>, vector<4x32xf32>
      %cst_35 = arith.constant dense<0.000000e+00> : vector<8x32xf32>
      %65 = tpu.matmul %63, %64, %cst_35 {dimension_numbers = #tpu.dot_dimension_numbers<[1], [0], [0], [1], [0, 0, 1, 1], [], []>} : vector<8x4xf32>, vector<4x32xf32>, vector<8x32xf32> -> vector<8x32xf32>
      %c0_36 = arith.constant 0 : index
      %c0_37 = arith.constant 0 : index
      %66 = vector.load %arg14[%c0_36, %c0_37] : memref<8x32xf32, #tpu.memory_space<vmem>>, vector<8x32xf32>
      %67 = arith.addf %66, %65 : vector<8x32xf32>
      %c0_38 = arith.constant 0 : index
      %c0_39 = arith.constant 0 : index
      %68 = vector.load %arg12[%c0_38, %c0_39] : memref<1x32xf32, #tpu.memory_space<vmem>>, vector<1x32xf32>
      %69 = vector.broadcast %68 : vector<1x32xf32> to vector<8x32xf32>
      %70 = arith.addf %67, %69 : vector<8x32xf32>
      %cst_40 = arith.constant 0.000000e+00 : f32
      %71 = vector.broadcast %cst_40 : f32 to vector<8x32xf32>
      %72 = arith.maximumf %70, %71 : vector<8x32xf32>
      %c0_41 = arith.constant 0 : index
      %c0_42 = arith.constant 0 : index
      %73 = vector.load %arg13[%c0_41, %c0_42] : memref<8x32xf32, #tpu.memory_space<vmem>>, vector<8x32xf32>
      tpu.vector_store %arg13[%c0_41, %c0_42], %72 {strides = array<i32>} : memref<8x32xf32, #tpu.memory_space<vmem>>, vector<8x32xf32>,
    } else {
    }
    return
  }
  func.func @transform_0(%arg0: i32, %arg1: i32) -> (i32, i32) {
    %c0_i32 = arith.constant 0 : i32
    %c0_i32_0 = arith.constant 0 : i32
    %c0_i32_1 = arith.constant 0 : i32
    return %c0_i32, %c0_i32_0 : i32, i32
  }
  func.func @transform_1(%arg0: i32, %arg1: i32) -> (i32, i32) {
    %c0_i32 = arith.constant 0 : i32
    %c0_i32_0 = arith.constant 0 : i32
    return %arg0, %c0_i32 : i32, i32
  }
  func.func @transform_2(%arg0: i32, %arg1: i32) -> (i32, i32) {
    %c0_i32 = arith.constant 0 : i32
    %c0_i32_0 = arith.constant 0 : i32
    return %arg1, %c0_i32 : i32, i32
  }
  func.func @transform_3(%arg0: i32, %arg1: i32) -> (i32, i32) {
    %c0_i32 = arith.constant 0 : i32
    %c0_i32_0 = arith.constant 0 : i32
    return %c0_i32, %arg1 : i32, i32
  }
  func.func @transform_4(%arg0: i32, %arg1: i32) -> (i32, i32) {
    %c0_i32 = arith.constant 0 : i32
    %c0_i32_0 = arith.constant 0 : i32
    return %arg1, %c0_i32 : i32, i32
  }
  func.func @transform_5(%arg0: i32, %arg1: i32) -> (i32, i32) {
    %c0_i32 = arith.constant 0 : i32
    %c0_i32_0 = arith.constant 0 : i32
    %c0_i32_1 = arith.constant 0 : i32
    return %c0_i32, %c0_i32_0 : i32, i32
  }
  func.func @transform_6(%arg0: i32, %arg1: i32) -> (i32, i32) {
    %c0_i32 = arith.constant 0 : i32
    %c0_i32_0 = arith.constant 0 : i32
    %c0_i32_1 = arith.constant 0 : i32
    return %c0_i32, %c0_i32_0 : i32, i32
  }
  func.func @transform_7(%arg0: i32, %arg1: i32) -> (i32, i32) {
    %c0_i32 = arith.constant 0 : i32
    %c0_i32_0 = arith.constant 0 : i32
    %c0_i32_1 = arith.constant 0 : i32
    return %c0_i32, %c0_i32_0 : i32, i32
  }
  func.func @transform_8(%arg0: i32, %arg1: i32) -> (i32, i32) {
    %c0_i32 = arith.constant 0 : i32
    %c0_i32_0 = arith.constant 0 : i32
    %c0_i32_1 = arith.constant 0 : i32
    return %c0_i32, %c0_i32_0 : i32, i32
  }
  func.func @transform_9(%arg0: i32, %arg1: i32) -> (i32, i32) {
    %c0_i32 = arith.constant 0 : i32
    %c0_i32_0 = arith.constant 0 : i32
    %c0_i32_1 = arith.constant 0 : i32
    return %c0_i32, %c0_i32_0 : i32, i32
  }
  func.func @transform_10(%arg0: i32, %arg1: i32) -> (i32, i32) {
    %c0_i32 = arith.constant 0 : i32
    %c0_i32_0 = arith.constant 0 : i32
    %c0_i32_1 = arith.constant 0 : i32
    return %c0_i32, %c0_i32_0 : i32, i32
  }
  func.func @transform_11(%arg0: i32, %arg1: i32) -> (i32, i32) {
    %c0_i32 = arith.constant 0 : i32
    %c0_i32_0 = arith.constant 0 : i32
    return %arg0, %c0_i32 : i32, i32
  }
}

</mosaic_0001>

<bundles_post_ra>
// kernel: tpu_custom_call.1
= control target key start
LH: loop header
LB: loop body
LE: loop exit
PB: predicated region body
PF: predicated region fallthrough
CT: control target
= control target key end

     0   :  { %s2772_s0 = inlined_call_operand.vmem [shape: f32[16,4], index: 0, kind: input, shape index: {}]   ;;  %s2773_s1 = inlined_call_operand.vmem [shape: f32[16,4], index: 1, kind: input, shape index: {}]   ;;  %s2774_s2 = inlined_call_operand.vmem [shape: s32[128,1], index: 2, kind: input, shape index: {}]   ;;  %s2775_s3 = inlined_call_operand.vmem [shape: s32[1,128], index: 3, kind: input, shape index: {}]   ;;  %s2776_s4 = inlined_call_operand.vmem [shape: f32[128,8], index: 4, kind: input, shape index: {}]   ;;  %s2777_s5 = inlined_call_operand.vmem [shape: f32[8,128], index: 5, kind: input, shape index: {}]   ;;  %s2778_s6 = inlined_call_operand.vmem [shape: f32[1,128], index: 6, kind: input, shape index: {}]   ;;  %s2779_s7 = inlined_call_operand.vmem [shape: f32[128,128], index: 7, kind: input, shape index: {}]   ;;  %s2780_s8 = inlined_call_operand.vmem [shape: f32[1,128], index: 8, kind: input, shape index: {}]   ;;  %s2781_s9 = inlined_call_operand.vmem [shape: f32[4,32], index: 9, kind: input, shape index: {}]   ;;  %s2782_s10 = inlined_call_operand.vmem [shape: f32[1,32], index: 10, kind: input, shape index: {}]   ;;  %s2783_s11 = inlined_call_operand.hbm [shape: f32[16,32], index: 11, kind: output, shape index: {}]  }
   0x1   :  { %2784 = sst [smem:[#allocation6_spill]] %s2772_s0 }
   0x2   :  { %2785 = sst [smem:[#allocation7_spill]] %s2773_s1 }
   0x3   :  { %2786 = sst [smem:[#allocation8_spill]] %s2777_s5 }
   0x4   :  { %16 = vsyncpa [#allocation4], 0 }
   0x5   :  { %18 = vsyncpa [#allocation4 + $0x1], 0  ;;  %s2048_s17 = smov 0   ;;  %s2050_s18 = smov 0  }
   0x6   :  { %s2052_s19 = smov 0   ;;  %s2054_s20 = smov 0  }
   0x7   :  { %s2056_s21 = smov 0   ;;  %s2058_s22 = smov 0  }
   0x8 LB: > { %s1700_s23 = sadd.s32 4294967295, %s1977_s22   ;;  %s1701_s24 = sadd.s32 4294967294, %s1977_s22   ;;  %s1977_s22 = sphi %s2058_s22, %s24_s22   ;;  %s1973_s21 = sphi %s2056_s21, %s2796_s21   ;;  %s1969_s20 = sphi %s2054_s20, %s2795_s20   ;;  %s1965_s19 = sphi %s2052_s19, %s2794_s19   ;;  %s1961_s18 = sphi %s2050_s18, %s2793_s18   ;;  %s1957_s17 = sphi %s2048_s17, %s2792_s17  }
   0x9   : > { %s36_s25 = sadd.s32 1, %s1973_s21  ;;  %s294_s26 = sadd.s32 1, %s1965_s19 }
   0xa   : > { %p38_p0 = scmp.ge.s32.totalorder %s36_s25, 2  ;;  %p304_p1 = scmp.ne.s32.totalorder %s1965_s19, %s1961_s18 }
   0xb   : > { %p305_p2 = scmp.eq.s32.totalorder %s1700_s23, 1  ;;  %p310_p3 = scmp.ne.s32.totalorder %s1961_s18, %s1957_s17 }
   0xc   : > { %s2798_s25 = smov (%p38_p0, %s36_s25), 0  ;;  %p311_p5 = scmp.eq.s32.totalorder %s1701_s24, 1 }
   0xd   : > { %p2088_p4 = por %p305_p2, %p304_p1  ;;  %s291_s28 = ssub.s32 %s1973_s21, %s2798_s25 }
   0xe   : > { %p1707_p6 = scmp.ge.s32.totalorder %s1977_s22, 1  ;;  %p292_p7 = scmp.eq.s32.totalorder %s291_s28, 0 }
   0xf   : > { %p2095_p8 = por %p311_p5, %p310_p3  ;;  %p381_p9 = scmp.lt.s32.totalorder %s1977_s22, 3 }
  0x10   : > { %s2101_s30 = scalar_select %p292_p7, %s1965_s19, %s294_s26  }
  0x11   : > { %p382_p10 = pnand %p1707_p6, %p381_p9 }
  0x12   : > { %s2789_s5 = sld [smem:[#allocation8_spill]] (!%p382_p10)  ;;  %s1984_s26 = smov (!%p382_p10), 96  }
  0x13   : > { %385 = sbr.rel (%p382_p10) target bundleno = 907 (0x38b), region = 64  ;;  %s2790_s0 = sld [smem:[#allocation6_spill]] (!%p382_p10) }
  0x14   : > { %s1985_s28 = smov (!%p382_p10), 64   ;;  %s1986_s12 = smov (!%p382_p10), 32  }
  0x15   : > { %p433_p11 = scmp.lt.s32.totalorder (!%p382_p10), %s1969_s20, 1  ;;  %s2791_s1 = sld [smem:[#allocation7_spill]] (!%p382_p10) }
  0x16   : > { %s430_s13 = sand.u32 (!%p382_p10), 1, %s1961_s18  }
  0x17   : > { %s1708_s14 = sshll.u32 (!%p382_p10), %s430_s13, 3 }
  0x18   : > { %v698_v0 = vld [vmem:[%s2774_s2 + $0x10] sm:$0xff]  ;;  %v696_v1 = vld [vmem:[%s2774_s2] sm:$0xff]  ;;  %v1979_v2 = vmov 0   ;;  %v699_v3 = vld [vmem:[%s2774_s2 + $0x18] sm:$0xff]  ;;  %vm479_vm0 = vcmask 64512   ;;  %v694_v24 = vlaneseq  ;;  %vm794_vm1 = vcmask 130048  }
  0x19   : > { %1831 = vset.pattern.permute.xlu1 %v1979_v2  ;;  %1830 = vset.pattern.permute.xlu0 %v1979_v2  ;;  %v697_v4 = vld [vmem:[%s2774_s2 + $0x8] sm:$0xff]  ;;  %v700_v5 = vld [vmem:[%s2774_s2 + $0x20] sm:$0xff]  ;;  %v703_v9 = vld [vmem:[%s2774_s2 + $0x38] sm:$0xff]  ;;  %v1980_v28 = vmov 0.0   ;;  %s434_s15 = scalar_select %p433_p11, %s1969_s20, 1 }
  0x1a   : > { %719 = vperm.xlu1 %1831, %v698_v0   ;;  %713 = vperm.xlu0 %1830, %v696_v1   ;;  %v474_v6 = vld [vmem:[%s2789_s5] sm:$0xff]  ;;  %v793_v8 = vld [vmem:[%s2790_s0 + $0x8] sm:$0xff]  ;;  %v702_v10 = vld [vmem:[%s2774_s2 + $0x30] sm:$0xff]  ;;  %v2184_v26 = vand.u32 127, %v694_v24  ;;  %s1742_s5 = sshll.u32 %s1969_s20, 3 }
  0x1b   : > { %1832 = vset.pattern.permute.xlu2 %v1979_v2  ;;  %543 = vmatpush.msra.mxu0 %v474_v6  ;;  %v458_v7 = vld [vmem:[%s2776_s4] sm:$0xff]  ;;  %v701_v11 = vld [vmem:[%s2774_s2 + $0x28] sm:$0xff]  ;;  %v706_v13 = vld [vmem:[%s2774_s2 + $0x50] sm:$0xff]  ;;  %s1709_s24 = sshll.u32 %s434_s15, 3 }
  0x1c   : > { %725 = vperm.xlu2 %1832, %v700_v5   ;;  %1710 = vmatmul.msk.f32.vlgmr.msra.gmra.mxu0 %vm479_vm0, %v458_v7  ;;  %v459_v12 = vld [vmem:[%s2776_s4 + $0x8] sm:$0xff]  ;;  %v704_v15 = vld [vmem:[%s2774_s2 + $0x40] sm:$0xff]  ;;  %v460_v16 = vld [vmem:[%s2776_s4 + $0x10] sm:$0xff] }
  0x1d   : > { %857 = vmatpush.msra.mxu2 %v793_v8  ;;  %v705_v14 = vld [vmem:[%s2774_s2 + $0x48] sm:$0xff]  ;;  %v708_v18 = vld [vmem:[%s2774_s2 + $0x60] sm:$0xff]  ;;  %v707_v19 = vld [vmem:[%s2774_s2 + $0x58] sm:$0xff] }
  0x1e   : > { %v709_v17 = vld [vmem:[%s2774_s2 + $0x68] sm:$0xff]  ;;  %v711_v20 = vld [vmem:[%s2774_s2 + $0x78] sm:$0xff]  ;;  %v710_v21 = vld [vmem:[%s2774_s2 + $0x70] sm:$0xff] }
  0x1f   : > { %v792_v22 = vld [vmem:[%s2790_s0] sm:$0xff]  ;;  %v461_v23 = vld [vmem:[%s2776_s4 + $0x18] sm:$0xff]  ;;  %v463_v31 = vld [vmem:[%s2776_s4 + $0x28] sm:$0xff] }
  0x20   : > { %858 = vmatpush.msra.mxu2 %v792_v22  ;;  %v462_v25 = vld [vmem:[%s2776_s4 + $0x20] sm:$0xff]  ;;  %v464_v34 = vld [vmem:[%s2776_s4 + $0x30] sm:$0xff]  ;;  %v465_v37 = vld [vmem:[%s2776_s4 + $0x38] sm:$0xff] }
  0x21   : > { %v624_v40 = vld [vmem:[%s2779_s7 + $0x78] sm:$0xff]  ;;  %v466_v41 = vld [vmem:[%s2776_s4 + $0x40] sm:$0xff]  ;;  %v623_v43 = vld [vmem:[%s2779_s7 + $0x70] sm:$0xff] }
  0x22   : > { %722 = vperm.xlu1 %1831, %v699_v3   ;;  %716 = vperm.xlu0 %1830, %v697_v4   ;;  %v622_v44 = vld [vmem:[%s2779_s7 + $0x68] sm:$0xff]  ;;  %v621_v46 = vld [vmem:[%s2779_s7 + $0x60] sm:$0xff]  ;;  %v620_v48 = vld [vmem:[%s2779_s7 + $0x58] sm:$0xff] }
  0x23   : > { %629 = vmatpush.msra.mxu1 %v624_v40  ;;  %1750 = vmatpush.msra.mxu3 %v624_v40  ;;  %v467_v47 = vld [vmem:[%s2776_s4 + $0x48] sm:$0xff]  ;;  %v619_v50 = vld [vmem:[%s2779_s7 + $0x50] sm:$0xff]  ;;  %v617_v53 = vld [vmem:[%s2779_s7 + $0x40] sm:$0xff] }
  0x24   : > { %728 = vperm.xlu2 %1832, %v701_v11   ;;  %1711 = vmatmul.msk.f32.gmra.mxu0 %vm479_vm0, %v459_v12  ;;  %v618_v51 = vld [vmem:[%s2779_s7 + $0x48] sm:$0xff]  ;;  %v468_v54 = vld [vmem:[%s2776_s4 + $0x50] sm:$0xff]  ;;  %v616_v55 = vld [vmem:[%s2779_s7 + $0x38] sm:$0xff] }
  0x25   : > { %630 = vmatpush.msra.mxu1 %v623_v43  ;;  %1751 = vmatpush.msra.mxu3 %v623_v43  ;;  %v615_v57 = vld [vmem:[%s2779_s7 + $0x30] sm:$0xff]  ;;  %v614_v58 = vld [vmem:[%s2779_s7 + $0x28] sm:$0xff]  ;;  %v613_v60 = vld [vmem:[%s2779_s7 + $0x20] sm:$0xff] }
  0x26   : > { %v469_v61 = vld [vmem:[%s2776_s4 + $0x58] sm:$0xff]  ;;  %v2280_v0 = vld [vmem:[%s2778_s6] ss:$0 sm:$0xff]  ;;  %v611_v3 = vld [vmem:[%s2779_s7 + $0x10] sm:$0xff] }
  0x27   : > { %631 = vmatpush.msra.mxu1 %v622_v44  ;;  %1752 = vmatpush.msra.mxu3 %v622_v44  ;;  %v612_v62 = vld [vmem:[%s2779_s7 + $0x18] sm:$0xff]  ;;  %v610_v4 = vld [vmem:[%s2779_s7 + $0x8] sm:$0xff]  ;;  %v609_v6 = vld [vmem:[%s2779_s7] sm:$0xff] }
  0x29   : > { %632 = vmatpush.msra.mxu1 %v621_v46  ;;  %1753 = vmatpush.msra.mxu3 %v621_v46 }
  0x2a   : > { %734 = vperm.xlu1 %1831, %v703_v9   ;;  %731 = vperm.xlu0 %1830, %v702_v10   ;;  %v470_v10 = vld [vmem:[%s2776_s4 + $0x60] sm:$0xff] }
  0x2b   : > { %633 = vmatpush.msra.mxu1 %v620_v48  ;;  %1754 = vmatpush.msra.mxu3 %v620_v48 }
  0x2c   : > { %737 = vperm.xlu2 %1832, %v704_v15   ;;  %1712 = vmatmul.msk.f32.gmra.mxu0 %vm479_vm0, %v460_v16 }
  0x2d   : > { %634 = vmatpush.msra.mxu1 %v619_v50  ;;  %1755 = vmatpush.msra.mxu3 %v619_v50  ;;  %v1983_v50 = vmov 2  }
  0x2f   : > { %635 = vmatpush.msra.mxu1 %v618_v51  ;;  %1756 = vmatpush.msra.mxu3 %v618_v51 }
  0x31   : > { %636 = vmatpush.msra.mxu1 %v617_v53  ;;  %1757 = vmatpush.msra.mxu3 %v617_v53 }
  0x32   : > { %743 = vperm.xlu1 %1831, %v706_v13   ;;  %740 = vperm.xlu0 %1830, %v705_v14   ;;  %v471_v13 = vld [vmem:[%s2776_s4 + $0x68] sm:$0xff] }
  0x33   : > { %637 = vmatpush.msra.mxu1 %v616_v55  ;;  %1758 = vmatpush.msra.mxu3 %v616_v55 }
  0x34   : > { %746 = vperm.xlu2 %1832, %v707_v19   ;;  %1713 = vmatmul.msk.f32.gmra.mxu0 %vm479_vm0, %v461_v23  ;;  %v472_v19 = vld [vmem:[%s2776_s4 + $0x70] sm:$0xff] }
  0x35   : > { %638 = vmatpush.msra.mxu1 %v615_v57  ;;  %1759 = vmatpush.msra.mxu3 %v615_v57 }
  0x37   : > { %639 = vmatpush.msra.mxu1 %v614_v58  ;;  %1760 = vmatpush.msra.mxu3 %v614_v58 }
  0x39   : > { %640 = vmatpush.msra.mxu1 %v613_v60  ;;  %1761 = vmatpush.msra.mxu3 %v613_v60 }
  0x3a   : > { %752 = vperm.xlu1 %1831, %v709_v17   ;;  %749 = vperm.xlu0 %1830, %v708_v18  }
  0x3b   : > { %641 = vmatpush.msra.mxu1 %v612_v62  ;;  %1762 = vmatpush.msra.mxu3 %v612_v62 }
  0x3c   : > { %755 = vperm.xlu2 %1832, %v710_v21   ;;  %1714 = vmatmul.msk.f32.gmra.mxu0 %vm479_vm0, %v462_v25 }
  0x3d   : > { %642 = vmatpush.msra.mxu1 %v611_v3  ;;  %1763 = vmatpush.msra.mxu3 %v611_v3 }
  0x3f   : > { %643 = vmatpush.msra.mxu1 %v610_v4  ;;  %1764 = vmatpush.msra.mxu3 %v610_v4 }
  0x41   : > { %644 = vmatpush.msra.mxu1 %v609_v6  ;;  %1765 = vmatpush.msra.mxu3 %v609_v6 }
  0x42   : > { %758 = vperm.xlu0 %1830, %v711_v20  }
  0x44   : > { %1715 = vmatmul.msk.f32.gmra.mxu0 %vm479_vm0, %v463_v31  ;;  %v1982_v31 = vmov 3  }
  0x4a   : > { %1835 = vset.pattern.permute.xlu0 %v1982_v31 }
  0x4c   : > { %1716 = vmatmul.msk.f32.gmra.mxu0 %vm479_vm0, %v464_v34 }
  0x54   : > { %1717 = vmatmul.msk.f32.gmra.mxu0 %vm479_vm0, %v465_v37 }
  0x5c   : > { %1718 = vmatmul.msk.f32.gmra.mxu0 %vm479_vm0, %v466_v41 }
  0x64   : > { %1719 = vmatmul.msk.f32.gmra.mxu0 %vm479_vm0, %v467_v47 }
  0x6c   : > { %1720 = vmatmul.msk.f32.gmra.mxu0 %vm479_vm0, %v468_v54 }
  0x74   : > { %1721 = vmatmul.msk.f32.gmra.mxu0 %vm479_vm0, %v469_v61 }
  0x76   : > { %v726_v39 = vpop.permute.xlu2 %725 }
  0x77   : > { %vm764_vm6 = vcmp.eq.s32.totalorder %v2184_v26, %v726_v39 }
  0x78   : > { %v780_v42 = vsel %vm764_vm6, 1.0, %v1980_v28 }
  0x7c   : > { %1722 = vmatmul.msk.f32.gmra.mxu0 %vm479_vm0, %v470_v10 }
  0x7e   : > { %v729_v45 = vpop.permute.xlu2 %728 }
  0x7f   : > { %vm765_vm7 = vcmp.eq.s32.totalorder %v2184_v26, %v729_v45 }
  0x80   : > { %v781_v49 = vsel %vm765_vm7, 1.0, %v1980_v28 }
  0x84   : > { %1723 = vmatmul.msk.f32.gmra.mxu0 %vm479_vm0, %v471_v13 }
  0x86   : > { %v738_v7 = vpop.permute.xlu2 %737 }
  0x87   : > { %vm768_vm10 = vcmp.eq.s32.totalorder %v2184_v26, %v738_v7 }
  0x88   : > { %v784_v9 = vsel %vm768_vm10, 1.0, %v1980_v28 }
  0x8c   : > { %v714_v27 = vpop.permute.xlu0 %713  ;;  %v720_v33 = vpop.permute.xlu1 %719  ;;  %1724 = vmatmul.msk.f32.gmra.mxu0 %vm479_vm0, %v472_v19 }
  0x8d   : > { %vm760_vm2 = vcmp.eq.s32.totalorder %v2184_v26, %v714_v27  ;;  %vm762_vm4 = vcmp.eq.s32.totalorder %v2184_v26, %v720_v33  ;;  %v473_v27 = vld [vmem:[%s2776_s4 + $0x78] sm:$0xff] }
  0x8e   : > { %v776_v29 = vsel %vm760_vm2, 1.0, %v1980_v28  ;;  %v778_v35 = vsel %vm762_vm4, 1.0, %v1980_v28  ;;  %v747_v22 = vpop.permute.xlu2 %746  ;;  %vm1542_vm4 = vcmask 1043456  }
  0x8f   : > { %1726 = vmatmul.msk.f32.vlgmr.msra.gmra.mxu2 %vm794_vm1, %v776_v29  ;;  %vm771_vm13 = vcmp.eq.s32.totalorder %v2184_v26, %v747_v22 }
  0x90   : > { %v787_v25 = vsel %vm771_vm13, 1.0, %v1980_v28 }
  0x94   : > { %v717_v30 = vpop.permute.xlu0 %716  ;;  %v723_v36 = vpop.permute.xlu1 %722  ;;  %1725 = vmatmul.msk.f32.gmra.mxu0 %vm479_vm0, %v473_v27 }
  0x95   : > { %vm761_vm3 = vcmp.eq.s32.totalorder %v2184_v26, %v717_v30  ;;  %vm763_vm5 = vcmp.eq.s32.totalorder %v2184_v26, %v723_v36  ;;  %v1981_v30 = vmov 1  }
  0x96   : > { %v777_v32 = vsel %vm761_vm3, 1.0, %v1980_v28  ;;  %v779_v38 = vsel %vm763_vm5, 1.0, %v1980_v28  ;;  %1833 = vset.pattern.permute.xlu2 %v1981_v30  ;;  %vm1538_vm5 = vcmask 31744  }
  0x97   : > { %1727 = vmatmul.msk.f32.gmra.mxu2 %vm794_vm1, %v777_v32 }
  0x99   : > { %v545_v1 = vpop.f32.mrf.mxu0 }
  0x9a   : > { %v546_v5 = vadd.f32 %v2280_v0, %v545_v1 }
  0x9c   : > { %v732_v52 = vpop.permute.xlu0 %731  ;;  %v735_v59 = vpop.permute.xlu1 %734  ;;  %v593_v8 = vmax.f32 %v546_v5, 0.0 }
  0x9d   : > { %vm766_vm8 = vcmp.eq.s32.totalorder %v2184_v26, %v732_v52  ;;  %vm767_vm9 = vcmp.eq.s32.totalorder %v2184_v26, %v735_v59 }
  0x9e   : > { %v782_v56 = vsel %vm766_vm8, 1.0, %v1980_v28  ;;  %v783_v63 = vsel %vm767_vm9, 1.0, %v1980_v28  ;;  %645 = vmatmul.f32.vlgmr.msra.gmra.mxu1 %v593_v8 }
  0x9f   : > { %1728 = vmatmul.msk.f32.gmra.mxu2 %vm794_vm1, %v778_v35 }
  0xa1   : > { %v548_v14 = vpop.f32.mrf.mxu0 }
  0xa2   : > { %v549_v16 = vadd.f32 %v2280_v0, %v548_v14 }
  0xa4   : > { %v741_v11 = vpop.permute.xlu0 %740  ;;  %v744_v15 = vpop.permute.xlu1 %743  ;;  %v594_v17 = vmax.f32 %v549_v16, 0.0 }
  0xa5   : > { %vm769_vm11 = vcmp.eq.s32.totalorder %v2184_v26, %v741_v11  ;;  %vm770_vm12 = vcmp.eq.s32.totalorder %v2184_v26, %v744_v15 }
  0xa6   : > { %v785_v12 = vsel %vm769_vm11, 1.0, %v1980_v28  ;;  %648 = vmatmul.f32.gmra.mxu1 %v594_v17  ;;  %v786_v18 = vsel %vm770_vm12, 1.0, %v1980_v28 }
  0xa7   : > { %1729 = vmatmul.msk.f32.gmra.mxu2 %vm794_vm1, %v779_v38  ;;  %v756_v38 = vpop.permute.xlu2 %755 }
  0xa8   : > { %vm774_vm0 = vcmp.eq.s32.totalorder %v2184_v26, %v756_v38 }
  0xa9   : > { %v551_v20 = vpop.f32.mrf.mxu0  ;;  %v790_v39 = vsel %vm774_vm0, 1.0, %v1980_v28 }
  0xaa   : > { %v552_v21 = vadd.f32 %v2280_v0, %v551_v20 }
  0xac   : > { %v595_v23 = vmax.f32 %v552_v21, 0.0  ;;  %v750_v29 = vpop.permute.xlu0 %749  ;;  %v753_v35 = vpop.permute.xlu1 %752 }
  0xad   : > { %vm772_vm14 = vcmp.eq.s32.totalorder %v2184_v26, %v750_v29  ;;  %vm773_vm15 = vcmp.eq.s32.totalorder %v2184_v26, %v753_v35 }
  0xae   : > { %651 = vmatmul.f32.gmra.mxu1 %v595_v23  ;;  %v788_v33 = vsel %vm772_vm14, 1.0, %v1980_v28  ;;  %v789_v37 = vsel %vm773_vm15, 1.0, %v1980_v28 }
  0xaf   : > { %1730 = vmatmul.msk.f32.gmra.mxu2 %vm794_vm1, %v780_v42 }
  0xb1   : > { %v554_v32 = vpop.f32.mrf.mxu0 }
  0xb2   : > { %v555_v34 = vadd.f32 %v2280_v0, %v554_v32 }
  0xb4   : > { %v596_v36 = vmax.f32 %v555_v34, 0.0  ;;  %v759_v40 = vpop.permute.xlu0 %758 }
  0xb5   : > { %vm775_vm2 = vcmp.eq.s32.totalorder %v2184_v26, %v759_v40 }
  0xb6   : > { %654 = vmatmul.f32.gmra.mxu1 %v596_v36  ;;  %v791_v42 = vsel %vm775_vm2, 1.0, %v1980_v28 }
  0xb7   : > { %1731 = vmatmul.msk.f32.gmra.mxu2 %vm794_vm1, %v781_v49 }
  0xb9   : > { %v557_v41 = vpop.f32.mrf.mxu0 }
  0xba   : > { %v558_v43 = vadd.f32 %v2280_v0, %v557_v41 }
  0xbc   : > { %v597_v44 = vmax.f32 %v558_v43, 0.0 }
  0xbe   : > { %657 = vmatmul.f32.gmra.mxu1 %v597_v44 }
  0xbf   : > { %1732 = vmatmul.msk.f32.gmra.mxu2 %vm794_vm1, %v782_v56 }
  0xc1   : > { %v560_v46 = vpop.f32.mrf.mxu0 }
  0xc2   : > { %v561_v47 = vadd.f32 %v2280_v0, %v560_v46 }
  0xc4   : > { %v598_v48 = vmax.f32 %v561_v47, 0.0 }
  0xc6   : > { %660 = vmatmul.f32.gmra.mxu1 %v598_v48 }
  0xc7   : > { %1733 = vmatmul.msk.f32.gmra.mxu2 %vm794_vm1, %v783_v63 }
  0xc9   : > { %v563_v26 = vpop.f32.mrf.mxu0 }
  0xca   : > { %v564_v51 = vadd.f32 %v2280_v0, %v563_v26 }
  0xcc   : > { %v599_v52 = vmax.f32 %v564_v51, 0.0 }
  0xce   : > { %663 = vmatmul.f32.gmra.mxu1 %v599_v52 }
  0xcf   : > { %1734 = vmatmul.msk.f32.gmra.mxu2 %vm794_vm1, %v784_v9 }
  0xd1   : > { %v566_v54 = vpop.f32.mrf.mxu0 }
  0xd2   : > { %v567_v55 = vadd.f32 %v2280_v0, %v566_v54 }
  0xd4   : > { %v600_v56 = vmax.f32 %v567_v55, 0.0 }
  0xd6   : > { %666 = vmatmul.f32.gmra.mxu1 %v600_v56 }
  0xd7   : > { %1735 = vmatmul.msk.f32.gmra.mxu2 %vm794_vm1, %v785_v12 }
  0xd9   : > { %v569_v58 = vpop.f32.mrf.mxu0 }
  0xda   : > { %v570_v59 = vadd.f32 %v2280_v0, %v569_v58 }
  0xdc   : > { %v601_v60 = vmax.f32 %v570_v59, 0.0 }
  0xde   : > { %669 = vmatmul.f32.gmra.mxu1 %v601_v60 }
  0xdf   : > { %1736 = vmatmul.msk.f32.gmra.mxu2 %vm794_vm1, %v786_v18 }
  0xe1   : > { %v572_v62 = vpop.f32.mrf.mxu0 }
  0xe2   : > { %v573_v63 = vadd.f32 %v2280_v0, %v572_v62 }
  0xe4   : > { %v602_v1 = vmax.f32 %v573_v63, 0.0 }
  0xe6   : > { %672 = vmatmul.f32.gmra.mxu1 %v602_v1 }
  0xe7   : > { %1737 = vmatmul.msk.f32.gmra.mxu2 %vm794_vm1, %v787_v25 }
  0xe9   : > { %v575_v4 = vpop.f32.mrf.mxu0 }
  0xea   : > { %v576_v5 = vadd.f32 %v2280_v0, %v575_v4 }
  0xec   : > { %v603_v6 = vmax.f32 %v576_v5, 0.0 }
  0xee   : > { %675 = vmatmul.f32.gmra.mxu1 %v603_v6 }
  0xef   : > { %1738 = vmatmul.msk.f32.gmra.mxu2 %vm794_vm1, %v788_v33  ;;  %v2393_v33 = vld [vmem:[%s2780_s8] ss:$0 sm:$0xff] }
  0xf1   : > { %v578_v7 = vpop.f32.mrf.mxu0 }
  0xf2   : > { %v579_v9 = vadd.f32 %v2280_v0, %v578_v7 }
  0xf4   : > { %v604_v10 = vmax.f32 %v579_v9, 0.0 }
  0xf6   : > { %678 = vmatmul.f32.vlgmr.msra.gmra.mxu3 %v604_v10 }
  0xf7   : > { %1739 = vmatmul.msk.f32.gmra.mxu2 %vm794_vm1, %v789_v37 }
  0xf9   : > { %v581_v12 = vpop.f32.mrf.mxu0 }
  0xfa   : > { %v582_v13 = vadd.f32 %v2280_v0, %v581_v12 }
  0xfc   : > { %v605_v14 = vmax.f32 %v582_v13, 0.0 }
  0xfe   : > { %681 = vmatmul.f32.gmra.mxu3 %v605_v14 }
  0xff   : > { %1740 = vmatmul.msk.f32.gmra.mxu2 %vm794_vm1, %v790_v39 }
 0x101   : > { %v584_v15 = vpop.f32.mrf.mxu0 }
 0x102   : > { %v585_v16 = vadd.f32 %v2280_v0, %v584_v15 }
 0x104   : > { %v606_v18 = vmax.f32 %v585_v16, 0.0 }
 0x106   : > { %684 = vmatmul.f32.gmra.mxu3 %v606_v18 }
 0x107   : > { %1741 = vmatmul.msk.f32.gmra.mxu2 %vm794_vm1, %v791_v42  ;;  %vm456_vm1 = vcmask 261120  }
 0x108   : > { %457 = vst.msk [vmem:[#allocation2] sm:$0xff] %vm456_vm1, %v1980_v28 }
 0x109   : > { %v587_v19 = vpop.f32.mrf.mxu0 }
 0x10a   : > { %v588_v20 = vadd.f32 %v2280_v0, %v587_v19 }
 0x10c   : > { %v607_v21 = vmax.f32 %v588_v20, 0.0 }
 0x10e   : > { %687 = vmatmul.f32.gmra.mxu3 %v607_v21 }
 0x111   : > { %v590_v23 = vpop.f32.mrf.mxu0 }
 0x112   : > { %v860_v45 = vpop.f32.mrf.mxu2  ;;  %v591_v25 = vadd.f32 %v2280_v0, %v590_v23 }
 0x113   : > { %1341 = vperm.xlu0 %1835, %v860_v45   ;;  %1021 = vperm.xlu2 %1833, %v860_v45  }
 0x114   : > { %910 = vperm.xlu1 %1831, %v860_v45   ;;  %v608_v27 = vmax.f32 %v591_v25, 0.0 }
 0x116   : > { %690 = vmatmul.f32.gmra.mxu3 %v608_v27 }
 0x11a   : > { %v863_v49 = vpop.f32.mrf.mxu2 }
 0x11b   : > { %1837 = vset.pattern.permute.xlu0 %v1981_v30  ;;  %1834 = vset.pattern.permute.xlu2 %v1983_v50  ;;  %v646_v0 = vpop.f32.mrf.mxu1 }
 0x11c   : > { %1181 = vperm.xlu2 %1834, %v860_v45   ;;  %1025 = vperm.xlu0 %1837, %v863_v49   ;;  %v2400_v35 = vadd.f32 %v2393_v33, %v646_v0 }
 0x11d   : > { %1841 = vset.pattern.permute.xlu1 %v1981_v30 }
 0x122   : > { %v866_v53 = vpop.f32.mrf.mxu2 }
 0x123   : > { %1029 = vperm.xlu1 %1841, %v866_v53   ;;  %v649_v38 = vpop.f32.mrf.mxu1 }
 0x124   : > { %1836 = vset.pattern.permute.xlu2 %v1979_v2  ;;  %1838 = vset.pattern.permute.xlu0 %v1983_v50  ;;  %v650_v39 = vadd.f32 %v2393_v33, %v649_v38 }
 0x125   : > { %1185 = vperm.xlu0 %1838, %v863_v49   ;;  %915 = vperm.xlu2 %1836, %v863_v49  }
 0x12a   : > { %v869_v57 = vpop.f32.mrf.mxu2 }
 0x12b   : > { %1842 = vset.pattern.permute.xlu1 %v1983_v50  ;;  %v652_v26 = vpop.f32.mrf.mxu1 }
 0x12c   : > { %1189 = vperm.xlu1 %1842, %v866_v53   ;;  %v653_v62 = vadd.f32 %v2393_v33, %v652_v26 }
 0x12d   : > { %1840 = vset.pattern.permute.xlu0 %v1979_v2  ;;  %1839 = vset.pattern.permute.xlu2 %v1982_v31 }
 0x12e   : > { %1345 = vperm.xlu2 %1839, %v863_v49   ;;  %920 = vperm.xlu0 %1840, %v866_v53  }
 0x132   : > { %v872_v61 = vpop.f32.mrf.mxu2 }
 0x133   : > { %v655_v56 = vpop.f32.mrf.mxu1 }
 0x134   : > { %1843 = vset.pattern.permute.xlu1 %v1982_v31  ;;  %v2448_v59 = vadd.f32 %v2393_v33, %v655_v56 }
 0x135   : > { %1349 = vperm.xlu1 %1843, %v866_v53  }
 0x136   : > { %1845 = vset.pattern.permute.xlu2 %v1981_v30 }
 0x137   : > { %1033 = vperm.xlu2 %1845, %v869_v57  }
 0x13a   : > { %v2353_v3 = vpop.f32.mrf.mxu2 }
 0x13b   : > { %935 = vperm.xlu0 %1840, %v2353_v3   ;;  %v658_v6 = vpop.f32.mrf.mxu1 }
 0x13d   : > { %1844 = vset.pattern.permute.xlu1 %v1979_v2 }
 0x13e   : > { %925 = vperm.xlu1 %1844, %v869_v57  }
 0x13f   : > { %1846 = vset.pattern.permute.xlu2 %v1983_v50 }
 0x140   : > { %1193 = vperm.xlu2 %1846, %v869_v57  }
 0x142   : > { %v878_v8 = vpop.f32.mrf.mxu2 }
 0x143   : > { %1854 = vset.pattern.permute.xlu0 %v1982_v31  ;;  %v661_v12 = vpop.f32.mrf.mxu1 }
 0x144   : > { %1361 = vperm.xlu0 %1854, %v2353_v3   ;;  %v2481_v13 = vadd.f32 %v2393_v33, %v661_v12 }
 0x146   : > { %1849 = vset.pattern.permute.xlu1 %v1981_v30 }
 0x147   : > { %1037 = vperm.xlu1 %1849, %v872_v61  }
 0x148   : > { %1847 = vset.pattern.permute.xlu2 %v1982_v31 }
 0x149   : > { %1353 = vperm.xlu2 %1847, %v869_v57  }
 0x14a   : > { %v881_v11 = vpop.f32.mrf.mxu2 }
 0x14c   : > { %1856 = vset.pattern.permute.xlu0 %v1981_v30 }
 0x14d   : > { %1045 = vperm.xlu0 %1856, %v878_v8  }
 0x14f   : > { %1851 = vset.pattern.permute.xlu1 %v1982_v31 }
 0x150   : > { %1357 = vperm.xlu1 %1851, %v872_v61  }
 0x151   : > { %1848 = vset.pattern.permute.xlu2 %v1979_v2 }
 0x152   : > { %930 = vperm.xlu2 %1848, %v872_v61   ;;  %v884_v17 = vpop.f32.mrf.mxu2 }
 0x155   : > { %1857 = vset.pattern.permute.xlu0 %v1983_v50 }
 0x156   : > { %1205 = vperm.xlu0 %1857, %v878_v8  }
 0x158   : > { %1855 = vset.pattern.permute.xlu1 %v1979_v2 }
 0x159   : > { %940 = vperm.xlu1 %1855, %v878_v8  }
 0x15a   : > { %1850 = vset.pattern.permute.xlu2 %v1983_v50  ;;  %v2374_v22 = vpop.f32.mrf.mxu2 }
 0x15b   : > { %1197 = vperm.xlu2 %1850, %v872_v61  }
 0x15e   : > { %1863 = vset.pattern.permute.xlu0 %v1979_v2 }
 0x15f   : > { %950 = vperm.xlu0 %1863, %v884_v17  }
 0x161   : > { %1858 = vset.pattern.permute.xlu1 %v1982_v31 }
 0x162   : > { %1365 = vperm.xlu1 %1858, %v878_v8   ;;  %v2383_v29 = vpop.f32.mrf.mxu2 }
 0x163   : > { %1852 = vset.pattern.permute.xlu2 %v1981_v30 }
 0x164   : > { %1041 = vperm.xlu2 %1852, %v2353_v3  }
 0x167   : > { %1868 = vset.pattern.permute.xlu0 %v1981_v30 }
 0x168   : > { %1057 = vperm.xlu0 %1868, %v2374_v22  }
 0x16a   : > { %1860 = vset.pattern.permute.xlu1 %v1981_v30  ;;  %v2397_v34 = vpop.f32.mrf.mxu2 }
 0x16b   : > { %1049 = vperm.xlu1 %1860, %v881_v11  }
 0x16c   : > { %1853 = vset.pattern.permute.xlu2 %v1983_v50 }
 0x16d   : > { %v2386_v32 = vpop.permute.xlu2 %1021  ;;  %1201 = vperm.xlu2 %1853, %v2353_v3  }
 0x170   : > { %1874 = vset.pattern.permute.xlu0 %v1982_v31 }
 0x171   : > { %1381 = vperm.xlu0 %1874, %v2383_v29  }
 0x172   : > { %v2411_v40 = vpop.f32.mrf.mxu2 }
 0x173   : > { %1861 = vset.pattern.permute.xlu1 %v1983_v50 }
 0x174   : > { %1209 = vperm.xlu1 %1861, %v881_v11  }
 0x175   : > { %1859 = vset.pattern.permute.xlu2 %v1979_v2 }
 0x176   : > { %v1182_v36 = vpop.permute.xlu2 %1181  ;;  %945 = vperm.xlu2 %1859, %v881_v11  }
 0x177   : > { %v2404_v37 = vmul.f32 %v1182_v36, %v2400_v35 }
 0x179   : > { %1875 = vset.pattern.permute.xlu0 %v1979_v2 }
 0x17a   : > { %965 = vperm.xlu0 %1875, %v2397_v34   ;;  %v2425_v48 = vpop.f32.mrf.mxu2 }
 0x17c   : > { %1862 = vset.pattern.permute.xlu1 %v1982_v31 }
 0x17d   : > { %1369 = vperm.xlu1 %1862, %v881_v11   ;;  %v2477_v11 = vadd.f32 %v2393_v33, %v658_v6  ;;  %v1084_v6 = vmul.f32 %v2386_v32, %v2400_v35 }
 0x17e   : > { %1864 = vset.pattern.permute.xlu2 %v1981_v30 }
 0x17f   : > { %v916_v41 = vpop.permute.xlu2 %915  ;;  %1053 = vperm.xlu2 %1864, %v884_v17  }
 0x180   : > { %v2413_v42 = vmul.f32 %v916_v41, %v650_v39 }
 0x182   : > { %1877 = vset.pattern.permute.xlu0 %v1983_v50  ;;  %v2439_v54 = vpop.f32.mrf.mxu2 }
 0x183   : > { %1225 = vperm.xlu0 %1877, %v2397_v34  }
 0x185   : > { %v1342_v43 = vpop.permute.xlu0 %1341  ;;  %1865 = vset.pattern.permute.xlu1 %v1983_v50 }
 0x186   : > { %v2419_v44 = vmul.f32 %v1342_v43, %v2400_v35  ;;  %v911_v45 = vpop.permute.xlu1 %910  ;;  %1213 = vperm.xlu1 %1865, %v884_v17  }
 0x187   : > { %v2422_v46 = vmul.f32 %v911_v45, %v2400_v35  ;;  %1866 = vset.pattern.permute.xlu2 %v1982_v31 }
 0x188   : > { %v1346_v47 = vpop.permute.xlu2 %1345  ;;  %1373 = vperm.xlu2 %1866, %v884_v17  }
 0x189   : > { %v2427_v49 = vmul.f32 %v1346_v47, %v650_v39 }
 0x18a   : > { %v2456_v63 = vpop.f32.mrf.mxu2 }
 0x18b   : > { %1880 = vset.pattern.permute.xlu0 %v1981_v30 }
 0x18c   : > { %1069 = vperm.xlu0 %1880, %v2411_v40  }
 0x18e   : > { %v1026_v51 = vpop.permute.xlu0 %1025  ;;  %1867 = vset.pattern.permute.xlu1 %v1979_v2 }
 0x18f   : > { %v2432_v52 = vmul.f32 %v1026_v51, %v650_v39  ;;  %955 = vperm.xlu1 %1867, %v2374_v22  }
 0x190   : > { %1869 = vset.pattern.permute.xlu2 %v1983_v50 }
 0x191   : > { %v2436_v53 = vpop.permute.xlu2 %1033  ;;  %1217 = vperm.xlu2 %1869, %v2374_v22  }
 0x194   : > { %1887 = vset.pattern.permute.xlu0 %v1979_v2 }
 0x195   : > { %v1030_v55 = vpop.permute.xlu1 %1029  ;;  %980 = vperm.xlu0 %1887, %v2439_v54  }
 0x196   : > { %v1086_v15 = vmul.f32 %v1030_v55, %v653_v62 }
 0x197   : > { %v1186_v57 = vpop.permute.xlu0 %1185  ;;  %1872 = vset.pattern.permute.xlu1 %v1981_v30 }
 0x198   : > { %v2444_v58 = vmul.f32 %v1186_v57, %v650_v39  ;;  %1061 = vperm.xlu1 %1872, %v2383_v29  }
 0x199   : > { %1870 = vset.pattern.permute.xlu2 %v1982_v31 }
 0x19a   : > { %v1194_v60 = vpop.permute.xlu2 %1193  ;;  %1377 = vperm.xlu2 %1870, %v2374_v22  }
 0x19b   : > { %v2453_v61 = vmul.f32 %v1194_v60, %v2448_v59 }
 0x19d   : > { %1892 = vset.pattern.permute.xlu0 %v1981_v30 }
 0x19e   : > { %v1190_v1 = vpop.permute.xlu1 %1189  ;;  %1081 = vperm.xlu0 %1892, %v2456_v63  }
 0x19f   : > { %v2460_v3 = vmul.f32 %v1190_v1, %v653_v62 }
 0x1a0   : > { %v921_v4 = vpop.permute.xlu0 %920  ;;  %1878 = vset.pattern.permute.xlu1 %v1982_v31 }
 0x1a1   : > { %v2463_v5 = vmul.f32 %v921_v4, %v653_v62  ;;  %1385 = vperm.xlu1 %1878, %v2397_v34  }
 0x1a2   : > { %1871 = vset.pattern.permute.xlu2 %v1979_v2 }
 0x1a3   : > { %v1354_v7 = vpop.permute.xlu2 %1353  ;;  %960 = vperm.xlu2 %1871, %v2383_v29  }
 0x1a4   : > { %v2469_v8 = vmul.f32 %v1354_v7, %v2448_v59 }
 0x1a6   : > { %1894 = vset.pattern.permute.xlu0 %v1982_v31 }
 0x1a7   : > { %v1350_v9 = vpop.permute.xlu1 %1349  ;;  %1401 = vperm.xlu0 %1894, %v2456_v63  }
 0x1a8   : > { %v2473_v10 = vmul.f32 %v1350_v9, %v653_v62 }
 0x1a9   : > { %1879 = vset.pattern.permute.xlu1 %v1979_v2 }
 0x1aa   : > { %970 = vperm.xlu1 %1879, %v2411_v40  }
 0x1ab   : > { %1873 = vset.pattern.permute.xlu2 %v1983_v50 }
 0x1ac   : > { %v931_v14 = vpop.permute.xlu2 %930  ;;  %1221 = vperm.xlu2 %1873, %v2383_v29   ;;  %v664_v29 = vpop.f32.mrf.mxu1 }
 0x1ad   : > { %v2486_v16 = vmul.f32 %v931_v14, %v2477_v11  ;;  %v936_v17 = vpop.permute.xlu0 %935 }
 0x1ae   : > { %v2489_v18 = vmul.f32 %v936_v17, %v2481_v13 }
 0x1af   : > { %1120 = vrot.lane.b32.xlu0 %v1086_v15, %s1984_s26 }
 0x1b0   : > { %v926_v19 = vpop.permute.xlu1 %925 }
 0x1b1   : > { %v2493_v20 = vmul.f32 %v926_v19, %v2448_v59 }
 0x1b2   : > { %1881 = vset.pattern.permute.xlu1 %v1983_v50 }
 0x1b3   : > { %1229 = vperm.xlu1 %1881, %v2411_v40  }
 0x1b4   : > { %1876 = vset.pattern.permute.xlu2 %v1981_v30  ;;  %v667_v38 = vpop.f32.mrf.mxu1 }
 0x1b5   : > { %v1198_v21 = vpop.permute.xlu2 %1197  ;;  %1065 = vperm.xlu2 %1876, %v2397_v34   ;;  %v2529_v56 = vadd.f32 %v2393_v33, %v667_v38 }
 0x1b6   : > { %v2500_v22 = vmul.f32 %v1198_v21, %v2477_v11  ;;  %v1362_v23 = vpop.permute.xlu0 %1361 }
 0x1b7   : > { %v2503_v25 = vmul.f32 %v1362_v23, %v2481_v13 }
 0x1b9   : > { %v2505_v27 = vpop.permute.xlu1 %1037 }
 0x1bb   : > { %1882 = vset.pattern.permute.xlu1 %v1982_v31 }
 0x1bc   : > { %1389 = vperm.xlu1 %1882, %v2411_v40   ;;  %v665_v40 = vadd.f32 %v2393_v33, %v664_v29  ;;  %v670_v51 = vpop.f32.mrf.mxu1  ;;  %v1087_v29 = vmul.f32 %v2436_v53, %v2448_v59 }
 0x1bd   : > { %1883 = vset.pattern.permute.xlu2 %v1979_v2  ;;  %v2534_v57 = vadd.f32 %v2393_v33, %v670_v51 }
 0x1be   : > { %v1042_v0 = vpop.permute.xlu2 %1041  ;;  %975 = vperm.xlu2 %1883, %v2425_v48  }
 0x1bf   : > { %v1089_v34 = vmul.f32 %v1042_v0, %v2481_v13  ;;  %v2512_v36 = vpop.permute.xlu0 %1045 }
 0x1c0   : > { %v1090_v38 = vmul.f32 %v2512_v36, %v665_v40 }
 0x1c1   : > { %1126 = vrot.lane.b32.xlu0 %v1089_v34, %s1984_s26  ;;  %v1088_v34 = vmul.f32 %v2505_v27, %v2477_v11 }
 0x1c2   : > { %v1358_v39 = vpop.permute.xlu1 %1357 }
 0x1c3   : > { %v2516_v41 = vmul.f32 %v1358_v39, %v2477_v11 }
 0x1c4   : > { %1884 = vset.pattern.permute.xlu1 %v1981_v30  ;;  %v673_v17 = vpop.f32.mrf.mxu1 }
 0x1c5   : > { %1073 = vperm.xlu1 %1884, %v2425_v48   ;;  %v674_v21 = vadd.f32 %v2393_v33, %v673_v17 }
 0x1c6   : > { %1886 = vset.pattern.permute.xlu2 %v1982_v31 }
 0x1c7   : > { %v2522_v43 = vpop.permute.xlu2 %1201  ;;  %1393 = vperm.xlu2 %1886, %v2425_v48  }
 0x1c8   : > { %v1206_v45 = vpop.permute.xlu0 %1205  ;;  %v1249_v59 = vmul.f32 %v2522_v43, %v2481_v13 }
 0x1c9   : > { %v1250_v47 = vmul.f32 %v1206_v45, %v665_v40 }
 0x1cb   : > { %v941_v26 = vpop.permute.xlu1 %940  ;;  %1288 = vrot.lane.b32.xlu0 %v1250_v47, %s1985_s28 }
 0x1cc   : > { %v2526_v55 = vmul.f32 %v941_v26, %v665_v40  ;;  %v676_v26 = vpop.f32.mrf.mxu1 }
 0x1cd   : > { %1885 = vset.pattern.permute.xlu1 %v1983_v50  ;;  %v677_v11 = vadd.f32 %v2393_v33, %v676_v26 }
 0x1ce   : > { %1233 = vperm.xlu1 %1885, %v2425_v48  }
 0x1cf   : > { %1888 = vset.pattern.permute.xlu2 %v1981_v30 }
 0x1d0   : > { %v946_v60 = vpop.permute.xlu2 %945  ;;  %1077 = vperm.xlu2 %1888, %v2439_v54  }
 0x1d1   : > { %v2539_v62 = vmul.f32 %v946_v60, %v2529_v56  ;;  %v951_v1 = vpop.permute.xlu0 %950 }
 0x1d2   : > { %v2542_v4 = vmul.f32 %v951_v1, %v2534_v57 }
 0x1d4   : > { %v1366_v7 = vpop.permute.xlu1 %1365 }
 0x1d5   : > { %v2546_v48 = vmul.f32 %v1366_v7, %v665_v40 }
 0x1d6   : > { %1116 = vrot.lane.b32.xlu1 %v1084_v6, %s1984_s26 }
 0x1d7   : > { %1891 = vset.pattern.permute.xlu1 %v1979_v2  ;;  %v679_v2 = vpop.f32.mrf.mxu3 }
 0x1d8   : > { %1889 = vset.pattern.permute.xlu2 %v1983_v50  ;;  %v2562_v19 = vadd.f32 %v2393_v33, %v679_v2 }
 0x1d9   : > { %v1054_v30 = vpop.permute.xlu2 %1053  ;;  %1237 = vperm.xlu2 %1889, %v2439_v54  }
 0x1da   : > { %v1092_v9 = vmul.f32 %v1054_v30, %v2534_v57  ;;  %v1058_v12 = vpop.permute.xlu0 %1057 }
 0x1db   : > { %v1093_v17 = vmul.f32 %v1058_v12, %v674_v21 }
 0x1dc   : > { %1132 = vrot.lane.b32.xlu0 %v1092_v9, %s1984_s26 }
 0x1dd   : > { %v1050_v14 = vpop.permute.xlu1 %1049 }
 0x1de   : > { %985 = vperm.xlu1 %1891, %v2456_v63   ;;  %v1091_v60 = vmul.f32 %v1050_v14, %v2529_v56 }
 0x1e1   : > { %1890 = vset.pattern.permute.xlu2 %v1982_v31 }
 0x1e2   : > { %v1374_v32 = vpop.permute.xlu2 %1373  ;;  %1397 = vperm.xlu2 %1890, %v2439_v54  }
 0x1e3   : > { %v2557_v35 = vpop.permute.xlu0 %1381 }
 0x1e6   : > { %v1210_v15 = vpop.permute.xlu1 %1209  ;;  %1893 = vset.pattern.permute.xlu1 %v1983_v50  ;;  %v682_v50 = vpop.f32.mrf.mxu3 }
 0x1e7   : > { %1241 = vperm.xlu1 %1893, %v2456_v63   ;;  %v1251_v27 = vmul.f32 %v1210_v15, %v2529_v56 }
 0x1ea   : > { %1118 = vrot.lane.b32.xlu2 %v2432_v52, %s1984_s26 }
 0x1eb   : > { %v1218_v31 = vpop.permute.xlu2 %1217 }
 0x1ec   : > { %v1253_v23 = vmul.f32 %v1218_v31, %v674_v21  ;;  %v966_v54 = vpop.permute.xlu0 %965 }
 0x1ed   : > { %v2570_v0 = vmul.f32 %v966_v54, %v2562_v19 }
 0x1ee   : > { %1294 = vrot.lane.b32.xlu0 %v1253_v23, %s1985_s28  ;;  %v685_v53 = vpop.f32.mrf.mxu3  ;;  %v1412_v23 = vmul.f32 %v1374_v32, %v2534_v57 }
 0x1ef   : > { %v1370_v63 = vpop.permute.xlu1 %1369  ;;  %1122 = vrot.lane.b32.xlu1 %v1087_v29, %s1984_s26 }
 0x1f0   : > { %v1411_v43 = vmul.f32 %v1370_v63, %v2529_v56  ;;  %v686_v63 = vadd.f32 %v2393_v33, %v685_v53 }
 0x1f2   : > { %1124 = vrot.lane.b32.xlu2 %v1088_v34, %s1984_s26 }
 0x1f4   : > { %v1378_v52 = vpop.permute.xlu2 %1377 }
 0x1f5   : > { %v1413_v39 = vmul.f32 %v1378_v52, %v674_v21  ;;  %v1226_v45 = vpop.permute.xlu0 %1225 }
 0x1f6   : > { %v688_v6 = vpop.f32.mrf.mxu3  ;;  %v1255_v53 = vmul.f32 %v1226_v45, %v2562_v19 }
 0x1f7   : > { %1454 = vrot.lane.b32.xlu0 %v1413_v39, %s1986_s12  ;;  %1128 = vrot.lane.b32.xlu1 %v1090_v38, %s1984_s26  ;;  %v2593_v13 = vadd.f32 %v2393_v33, %v688_v6  ;;  %v1414_v39 = vmul.f32 %v2557_v35, %v677_v11 }
 0x1f8   : > { %v1214_v47 = vpop.permute.xlu1 %1213 }
 0x1f9   : > { %v1252_v2 = vmul.f32 %v1214_v47, %v2534_v57  ;;  %v683_v57 = vadd.f32 %v2393_v33, %v682_v50 }
 0x1fa   : > { %1286 = vrot.lane.b32.xlu2 %v1249_v59, %s1985_s28 }
 0x1fd   : > { %v961_v36 = vpop.permute.xlu2 %960 }
 0x1fe   : > { %v2585_v40 = vmul.f32 %v961_v36, %v677_v11  ;;  %v1070_v51 = vpop.permute.xlu0 %1069 }
 0x1ff   : > { %1290 = vrot.lane.b32.xlu1 %v1251_v27, %s1985_s28  ;;  %v1096_v36 = vmul.f32 %v1070_v51, %v683_v57 }
 0x201   : > { %v956_v1 = vpop.permute.xlu1 %955 }
 0x202   : > { %v2589_v7 = vmul.f32 %v956_v1, %v674_v21  ;;  %1130 = vrot.lane.b32.xlu2 %v1091_v60, %s1984_s26 }
 0x206   : > { %v1222_v30 = vpop.permute.xlu2 %1221 }
 0x207   : > { %v981_v9 = vpop.permute.xlu0 %980  ;;  %1450 = vrot.lane.b32.xlu1 %v1411_v43, %s1986_s12  ;;  %v1254_v34 = vmul.f32 %v1222_v30, %v677_v11 }
 0x208   : > { %v2599_v15 = vmul.f32 %v981_v9, %v2593_v13 }
 0x20a   : > { %v1062_v14 = vpop.permute.xlu1 %1061  ;;  %1292 = vrot.lane.b32.xlu2 %v1252_v2, %s1985_s28 }
 0x20b   : > { %v1094_v12 = vmul.f32 %v1062_v14, %v677_v11 }
 0x20f   : > { %v1066_v31 = vpop.permute.xlu2 %1065  ;;  %1134 = vrot.lane.b32.xlu1 %v1093_v17, %s1984_s26 }
 0x210   : > { %v1095_v56 = vmul.f32 %v1066_v31, %v2562_v19  ;;  %v2605_v54 = vpop.permute.xlu0 %1081 }
 0x212   : > { %1452 = vrot.lane.b32.xlu2 %v1412_v23, %s1986_s12  ;;  %1138 = vrot.lane.b32.xlu0 %v1095_v56, %s1984_s26 }
 0x213   : > { %v1386_v29 = vpop.permute.xlu1 %1385 }
 0x214   : > { %v1415_v35 = vmul.f32 %v1386_v29, %v2562_v19  ;;  %v691_v19 = vpop.f32.mrf.mxu3 }
 0x215   : > { %v2634_v14 = vadd.f32 %v2393_v33, %v691_v19 }
 0x217   : > { %1296 = vrot.lane.b32.xlu1 %v1254_v34, %s1985_s28 }
 0x218   : > { %v976_v21 = vpop.permute.xlu2 %975 }
 0x219   : > { %v2611_v52 = vmul.f32 %v976_v21, %v686_v63  ;;  %v1402_v38 = vpop.permute.xlu0 %1401 }
 0x21a   : > { %1136 = vrot.lane.b32.xlu2 %v1094_v12, %s1984_s26  ;;  %v1419_v17 = vmul.f32 %v1402_v38, %v2634_v14 }
 0x21c   : > { %v971_v32 = vpop.permute.xlu1 %970 }
 0x21d   : > { %v2616_v59 = vmul.f32 %v971_v32, %v683_v57 }
 0x21f   : > { %1456 = vrot.lane.b32.xlu1 %v1414_v39, %s1986_s12 }
 0x221   : > { %v1394_v47 = vpop.permute.xlu2 %1393  ;;  %v1121_v26 = vpop.permute.xlu0 %1120 }
 0x222   : > { %v2621_v27 = vadd.f32 %v1121_v26, %v2463_v5  ;;  %1298 = vrot.lane.b32.xlu2 %v1255_v53, %s1985_s28  ;;  %v1417_v21 = vmul.f32 %v1394_v47, %v686_v63 }
 0x225   : > { %v1230_v60 = vpop.permute.xlu1 %1229 }
 0x226   : > { %v1256_v1 = vmul.f32 %v1230_v60, %v683_v57 }
 0x227   : > { %1140 = vrot.lane.b32.xlu1 %v1096_v36, %s1984_s26 }
 0x228   : > { %1300 = vrot.lane.b32.xlu0 %v1256_v1, %s1985_s28 }
 0x22a   : > { %1458 = vrot.lane.b32.xlu2 %v1415_v35, %s1986_s12  ;;  %v1078_v50 = vpop.permute.xlu2 %1077 }
 0x22b   : > { %v1098_v51 = vmul.f32 %v1078_v50, %v2593_v13 }
 0x22e   : > { %v1390_v45 = vpop.permute.xlu1 %1389 }
 0x22f   : > { %v1416_v11 = vmul.f32 %v1390_v45, %v683_v57 }
 0x231   : > { %1460 = vrot.lane.b32.xlu0 %v1416_v11, %s1986_s12 }
 0x233   : > { %v1238_v5 = vpop.permute.xlu2 %1237  ;;  %v1127_v6 = vpop.permute.xlu0 %1126 }
 0x234   : > { %v1169_v43 = vadd.f32 %v1127_v6, %v2489_v18  ;;  %v1258_v31 = vmul.f32 %v1238_v5, %v2593_v13 }
 0x237   : > { %v1074_v30 = vpop.permute.xlu1 %1073 }
 0x238   : > { %v1097_v9 = vmul.f32 %v1074_v30, %v686_v63 }
 0x239   : > { %1144 = vrot.lane.b32.xlu0 %v1098_v51, %s1984_s26 }
 0x23a   : > { %1142 = vrot.lane.b32.xlu2 %v1097_v9, %s1984_s26 }
 0x23c   : > { %v1398_v2 = vpop.permute.xlu2 %1397 }
 0x23d   : > { %v1289_v34 = vpop.permute.xlu0 %1288  ;;  %v1418_v33 = vmul.f32 %v1398_v2, %v2593_v13 }
 0x240   : > { %v1234_v23 = vpop.permute.xlu1 %1233 }
 0x241   : > { %v1257_v56 = vmul.f32 %v1234_v23, %v686_v63  ;;  %1466 = vrot.lane.b32.xlu0 %v1419_v17, %s1986_s12  ;;  %v1099_v63 = vmul.f32 %v2605_v54, %v2634_v14 }
 0x242   : > { %1304 = vrot.lane.b32.xlu2 %v1258_v31, %s1985_s28 }
 0x243   : > { %1302 = vrot.lane.b32.xlu1 %v1257_v56, %s1985_s28 }
 0x244   : > { %v1119_v18 = vpop.permute.xlu2 %1118 }
 0x245   : > { %v2642_v29 = vadd.f32 %v1119_v18, %v2413_v42 }
 0x248   : > { %v1117_v12 = vpop.permute.xlu1 %1116 }
 0x249   : > { %v2646_v38 = vadd.f32 %v1117_v12, %v2422_v46  ;;  %1448 = vrot.lane.b32.xlu0 %v2546_v48, %s1986_s12 }
 0x24a   : > { %1464 = vrot.lane.b32.xlu2 %v1418_v33, %s1986_s12 }
 0x24b   : > { %1462 = vrot.lane.b32.xlu1 %v1417_v21, %s1986_s12 }
 0x24c   : > { %v1125_v57 = vpop.permute.xlu2 %1124 }
 0x24d   : > { %v2653_v32 = vadd.f32 %v1125_v57, %v2486_v16 }
 0x24e   : > { %v1133_v42 = vpop.permute.xlu0 %1132 }
 0x24f   : > { %v1172_v39 = vadd.f32 %v1133_v42, %v2542_v4 }
 0x250   : > { %v986_v13 = vpop.permute.xlu1 %985 }
 0x251   : > { %1282 = vrot.lane.b32.xlu0 %v2453_v61, %s1985_s28  ;;  %v1003_v31 = vmul.f32 %v986_v13, %v2634_v14 }
 0x252   : > { %1446 = vrot.lane.b32.xlu2 %v2503_v25, %s1986_s12 }
 0x253   : > { %1146 = vrot.lane.b32.xlu1 %v1099_v63, %s1984_s26  ;;  %s432_s26 = scalar_lea.vmem [#allocation3], %s1708_s14  ;;  %s1919_s14 = scalar_lea.hbm %s2783_s11, 16 }
 0x254   : > { %v1287_v46 = vpop.permute.xlu2 %1286 }
 0x255   : > { %v2663_v48 = vadd.f32 %v1287_v46, %v1169_v43 }
 0x259   : > { %1442 = vrot.lane.b32.xlu0 %v2469_v8, %s1986_s12  ;;  %v1242_v16 = vpop.permute.xlu1 %1241 }
 0x25a   : > { %v1259_v4 = vmul.f32 %v1242_v16, %v2634_v14  ;;  %1280 = vrot.lane.b32.xlu2 %v2460_v3, %s1985_s28 }
 0x25c   : > { %v1131_v54 = vpop.permute.xlu2 %1130  ;;  %1306 = vrot.lane.b32.xlu1 %v1259_v4, %s1985_s28 }
 0x25d   : > { %v1171_v61 = vadd.f32 %v1131_v54, %v2539_v62 }
 0x261   : > { %1276 = vrot.lane.b32.xlu0 %v2404_v37, %s1985_s28  ;;  %v1123_v25 = vpop.permute.xlu1 %1122 }
 0x262   : > { %v2675_v53 = vadd.f32 %v1123_v25, %v2493_v20  ;;  %1440 = vrot.lane.b32.xlu2 %v2473_v10, %s1986_s12 }
 0x264   : > { %v1293_v8 = vpop.permute.xlu2 %1292  ;;  %1284 = vrot.lane.b32.xlu1 %v2500_v22, %s1985_s28 }
 0x265   : > { %v2681_v3 = vadd.f32 %v1293_v8, %v1172_v39 }
 0x269   : > { %v1129_v47 = vpop.permute.xlu1 %1128 }
 0x26a   : > { %v1170_v26 = vadd.f32 %v1129_v47, %v2526_v55  ;;  %1436 = vrot.lane.b32.xlu2 %v2419_v44, %s1986_s12  ;;  %v1295_v44 = vpop.permute.xlu0 %1294 }
 0x26c   : > { %1444 = vrot.lane.b32.xlu1 %v2516_v41, %s1986_s12  ;;  %v2688_v37 = vadd.f32 %v1289_v34, %v1170_v26  ;;  %v1453_v60 = vpop.permute.xlu2 %1452 }
 0x271   : > { %v1291_v20 = vpop.permute.xlu1 %1290 }
 0x272   : > { %v1331_v62 = vadd.f32 %v1291_v20, %v1171_v61  ;;  %v1455_v1 = vpop.permute.xlu0 %1454 }
 0x274   : > { %1278 = vrot.lane.b32.xlu1 %v2444_v58, %s1985_s28  ;;  %v1137_v41 = vpop.permute.xlu2 %1136  ;;  %s1588_s28 = sshll.u32 %s432_s26, 4  ;;  %s1589_s28 = int_to_ptr.vmem [resolvable:$true] %s1588_s28 }
 0x275   : > { %v1174_v61 = vadd.f32 %v1137_v41, %v2585_v40 }
 0x279   : > { %v1451_v10 = vpop.permute.xlu1 %1450 }
 0x27a   : > { %v2692_v22 = vadd.f32 %v1451_v10, %v1331_v62  ;;  %v1492_v62 = vadd.f32 %v1453_v60, %v2681_v3 }
 0x27c   : > { %1438 = vrot.lane.b32.xlu1 %v2427_v49, %s1986_s12  ;;  %v1299_v45 = vpop.permute.xlu2 %1298  ;;  %s436_s12 = scalar_lea.vmem %s2791_s1, %s1709_s24  ;;  %s1586_s24 = scalar_lea.hbm %s2783_s11, %s1742_s5 }
 0x27d   : > { %s1576_s1 = scalar_lea.sflag [#allocation4], %s430_s13 }
 0x281   : > { %v1135_v55 = vpop.permute.xlu1 %1134 }
 0x282   : > { %v1173_v36 = vadd.f32 %v1135_v55, %v2589_v7 }
 0x284   : > { %v1139_v50 = vpop.permute.xlu0 %1138  ;;  %v1459_v6 = vpop.permute.xlu2 %1458 }
 0x285   : > { %v1175_v21 = vadd.f32 %v1139_v50, %v2570_v0  ;;  %v1333_v0 = vadd.f32 %v1295_v44, %v1173_v36 }
 0x287   : > { %v1335_v4 = vadd.f32 %v1299_v45, %v1175_v21  ;;  %v1493_v26 = vadd.f32 %v1455_v1, %v1333_v0 }
 0x289   : > { %v1297_v35 = vpop.permute.xlu1 %1296 }
 0x28a   : > { %v1334_v8 = vadd.f32 %v1297_v35, %v1174_v61 }
 0x291   : > { %v1457_v11 = vpop.permute.xlu1 %1456 }
 0x294   : > { %v1143_v51 = vpop.permute.xlu2 %1142 }
 0x295   : > { %v1177_v57 = vadd.f32 %v1143_v51, %v2611_v52  ;;  %v1495_v52 = vadd.f32 %v1459_v6, %v1335_v4  ;;  %v1536_v6 = vld [vmem:[%s436_s12] sm:$0xff]  ;;  %s1590_s12 = sshll.u32 %s1586_s24, 4  ;;  %s1591_s12 = int_to_ptr.hbm [resolvable:$true] %s1590_s12 }
 0x296   : > { %s1913_s15 = sshra.s32 %s1591_s12, 4  ;;  %s1914_s15 = int_to_ptr.hbm [resolvable:$true] %s1913_s15 }
 0x297   : > { %s1915_s20 = scalar_lea.hbm %s1914_s15, 8  ;;  %p1920_p1 = scmp.lt.s32.totalorder %s1914_s15, %s2783_s11 }
 0x298   : > { %p1916_p12 = scmp.ne.s32.totalorder %s1914_s15, %s1915_s20  ;;  %p1921_p2 = scmp.lt.s32.totalorder %s1919_s14, %s1915_s20 }
 0x299   : > { %v1141_v58 = vpop.permute.xlu1 %1140 }
 0x29a   : > { %v1301_v5 = vpop.permute.xlu0 %1300  ;;  %v1176_v42 = vadd.f32 %v1141_v58, %v2616_v59  ;;  %v1494_v59 = vadd.f32 %v1457_v11, %v1334_v8  ;;  %v1509_v58 = vld [vmem:[#allocation2] sm:$0xff]  ;;  %p1917_p13 = pnand %p1916_p12, %p2088_p4  ;;  %p1922_p3 = por %p1921_p2, %p1920_p1 }
 0x29c   : > { %v1305_v49 = vpop.permute.xlu2 %1304  ;;  %v1336_v14 = vadd.f32 %v1301_v5, %v1176_v42  ;;  %p1918_p0 = pneg %p1917_p13 }
 0x29e   : > { %p1923_p5 = pnand %p1922_p3, %p1918_p0 }
 0x2a3   : > { %v1461_v43 = vpop.permute.xlu0 %1460 }
 0x2a4   : > { %v1465_v7 = vpop.permute.xlu2 %1464  ;;  %v1496_v25 = vadd.f32 %v1461_v43, %v1336_v14 }
 0x2ab   : > { %v1145_v9 = vpop.permute.xlu0 %1144 }
 0x2ac   : > { %v1178_v23 = vadd.f32 %v1145_v9, %v2599_v15  ;;  %v1447_v63 = vpop.permute.xlu2 %1446  ;;  %v1898_v9 = vld [vmem:[%s2782_s10] ss:$0 sm:$0xff] }
 0x2ad   : > { %v1489_v55 = vadd.f32 %v1447_v63, %v2663_v48  ;;  %v1503_v48 = vstv %s1742_s5 }
 0x2ae   : > { %v1338_v33 = vadd.f32 %v1305_v49, %v1178_v23 }
 0x2b0   : > { %v1498_v16 = vadd.f32 %v1465_v7, %v1338_v33 }
 0x2b3   : > { %v1467_v2 = vpop.permute.xlu0 %1466 }
 0x2b4   : > { %v1281_v47 = vpop.permute.xlu2 %1280 }
 0x2b5   : > { %v1303_v30 = vpop.permute.xlu1 %1302  ;;  %v1326_v3 = vadd.f32 %v1281_v47, %v2621_v27  ;;  %v1897_v27 = vld [vmem:[%s2775_s3] ss:$0 sm:$0xff] }
 0x2b6   : > { %v1337_v46 = vadd.f32 %v1303_v30, %v1177_v57 }
 0x2bb   : > { %v1449_v56 = vpop.permute.xlu0 %1448 }
 0x2bc   : > { %v1490_v10 = vadd.f32 %v1449_v56, %v2688_v37  ;;  %v1441_v44 = vpop.permute.xlu2 %1440 }
 0x2bd   : > { %v1463_v19 = vpop.permute.xlu1 %1462 }
 0x2be   : > { %v1497_v13 = vadd.f32 %v1463_v19, %v1337_v46 }
 0x2c3   : > { %v1283_v15 = vpop.permute.xlu0 %1282 }
 0x2c4   : > { %v1327_v1 = vadd.f32 %v1283_v15, %v2675_v53 }
 0x2c5   : > { %v1147_v17 = vpop.permute.xlu1 %1146 }
 0x2c6   : > { %v1179_v18 = vadd.f32 %v1147_v17, %v1003_v31 }
 0x2cb   : > { %v1443_v40 = vpop.permute.xlu0 %1442 }
 0x2cc   : > { %v1487_v37 = vadd.f32 %v1443_v40, %v1327_v1 }
 0x2ce   : > { %v1307_v34 = vpop.permute.xlu1 %1306 }
 0x2cf   : > { %v1339_v12 = vadd.f32 %v1307_v34, %v1179_v18 }
 0x2d1   : > { %v1499_v39 = vadd.f32 %v1467_v2, %v1339_v12 }
 0x2d3   : > { %1510 = vmatpush.msrb.mxu3 %v1499_v39  ;;  %v1277_v60 = vpop.permute.xlu0 %1276 }
 0x2d4   : > { %v1324_v35 = vadd.f32 %v1277_v60, %v2646_v38  ;;  %v1537_v38 = vld [vmem:[%s2781_s9] sm:$0xf] }
 0x2d5   : > { %1511 = vmatpush.msrb.mxu3 %v1498_v16 }
 0x2d6   : > { %v1285_v54 = vpop.permute.xlu1 %1284 }
 0x2d7   : > { %1512 = vmatpush.msrb.mxu3 %v1497_v13  ;;  %v1328_v36 = vadd.f32 %v1285_v54, %v2653_v32  ;;  %v1486_v32 = vadd.f32 %v1441_v44, %v1326_v3 }
 0x2d9   : > { %1513 = vmatpush.msrb.mxu3 %v1496_v25 }
 0x2db   : > { %1514 = vmatpush.msrb.mxu3 %v1495_v52 }
 0x2dd   : > { %1515 = vmatpush.msrb.mxu3 %v1494_v59 }
 0x2de   : > { %v1445_v20 = vpop.permute.xlu1 %1444 }
 0x2df   : > { %1516 = vmatpush.msrb.mxu3 %v1493_v26  ;;  %v1488_v41 = vadd.f32 %v1445_v20, %v1328_v36 }
 0x2e1   : > { %1517 = vmatpush.msrb.mxu3 %v1492_v62 }
 0x2e3   : > { %1518 = vmatpush.msrb.mxu3 %v2692_v22  ;;  %v1502_v22 = vshrl.u32 %v694_v24, 7  ;;  %v1437_v24 = vpop.permute.xlu2 %1436 }
 0x2e4   : > { %v1484_v5 = vadd.f32 %v1437_v24, %v1324_v35 }
 0x2e5   : > { %1519 = vmatpush.msrb.mxu3 %v1490_v10  ;;  %v1504_v50 = vadd.s32 %v1503_v48, %v1502_v22 }
 0x2e6   : > { %v1279_v28 = vpop.permute.xlu1 %1278 }
 0x2e7   : > { %1520 = vmatpush.msrb.mxu3 %v1489_v55  ;;  %v1325_v53 = vadd.f32 %v1279_v28, %v2642_v29  ;;  %vm1507_vm3 = vcmp.eq.s32.totalorder %v1504_v50, %v1897_v27  ;;  %v1987_v29 = vmov 1.0  }
 0x2e9   : > { %1521 = vmatpush.msrb.mxu3 %v1488_v41 }
 0x2eb   : > { %1522 = vmatpush.msrb.mxu3 %v1487_v37 }
 0x2ed   : > { %1523 = vmatpush.msrb.mxu3 %v1486_v32 }
 0x2ee   : > { %v1439_v45 = vpop.permute.xlu1 %1438 }
 0x2ef   : > { %v1485_v11 = vadd.f32 %v1439_v45, %v1325_v53 }
 0x2f1   : > { %1524 = vmatpush.msrb.mxu3 %v1485_v11 }
 0x2f3   : > { %1525 = vmatpush.msrb.mxu3 %v1484_v5 }
 0x2f4   : > { %1743 = vmatmul.msk.f32.vlgmr.msrb.gmra.mxu3 %vm1507_vm3, %v1987_v29 }
 0x2f5   : > { %1744 = vmatpush.msk.msra.mxu3 %vm1542_vm4, %v1537_v38 }
 0x2fc   : > { %1745 = vmatmul.msk.f32.vlgmr.msra.gmra.mxu3 %vm1538_vm5, %v1536_v6 }
 0x377   : > { %v1527_v43 = vpop.f32.mrf.mxu3 }
 0x378   : > { %v1530_v51 = vadd.f32 %v1527_v43, %v1509_v58 }
 0x37a   : > { %1532 = vst.msk [vmem:[#allocation2] sm:$0xff] %vm456_vm1, %v1530_v51 }
 0x37f   : > { %v1563_v30 = vpop.f32.mrf.mxu3 }
 0x381   : > { %v1566_v19 = vld [vmem:[#allocation2] sm:$0xff] }
 0x382   : > { %v1567_v49 = vadd.f32 %v1566_v19, %v1563_v30 }
 0x384   : > { %v1572_v2 = vadd.f32 %v1898_v9, %v1567_v49 }
 0x386   : > { %v1573_v17 = vmax.f32 %v1572_v2, 0.0 }
 0x388   : > { %1574 = vst.msk [vmem:[%s432_s26] sm:$0xff] %vm456_vm1, %v1573_v17 }
 0x389   : > { %1926 = shalt.err (!%p1923_p5)
}
 0x38a   : > { %1766 = dma.vmem_to_hbm [thread:$0]  (%p2088_p4), %s1589_s28, 128, %s1591_s12, %s1576_s1  }
 0x38b PF: > { %p1772_p6 = scmp.ge.s32.totalorder %s1977_s22, 2  ;;  %s1602_s13 = sand.u32 1, %s1957_s17  }
 0x38c   : > { %s1603_s24 = scalar_lea.sflag [#allocation4], %s1602_s13 }
 0x38d   : > { %p1769_p7 = pnand %p1772_p6, %p2095_p8 }
 0x38f   : > { %p1770_p9 = pneg %p1769_p7 }
 0x391   : > { %1952 = dma.done.wait (%p1770_p9), %s1603_s24, 128  }
 0x392   : > { %1954 = vsyncadd (%p1770_p9), %s1603_s24, 4294967168  ;;  %s24_s22 = sadd.s32 1, %s1977_s22   ;;  %s2792_s17 = smov %s1961_s18 }
 0x393   : > { %p21_p10 = scmp.ge.s32.totalorder %s24_s22, 4   ;;  %s2793_s18 = smov %s1965_s19 }
 0x394   : > { %s2794_s19 = smov %s2101_s30  ;;  %s2795_s20 = smov %s1973_s21 }
 0x395   : > { %s2796_s21 = smov %s2798_s25  ;;  %23 = sbr.rel (!%p21_p10) target bundleno = 8 (0x8), region = 116 }
 0x39a   :  { %1609 = vsyncpa [#allocation4], 1 }
 0x39b   :  { %1611 = vsyncpa [#allocation4 + $0x1], 1 }

</bundles_post_ra>
